<compile_context>
chip_gen: v7x
topology: tpu7x:2x2x1
jax: 0.10.0
libtpu: 0.0.40
codegen_flags: <defaults>
</compile_context>

<pallas_src>
import jax
import jax.numpy as jnp
from jax import lax
from jax.experimental import pallas as pl
from jax.experimental.pallas import tpu as pltpu

# ---------------------------------------------------------------------------
# Model configuration (small, consistent with the module's constructor)
# ---------------------------------------------------------------------------
IN_FEATURES = 32
IMAGE_SHAPE = (4, 16, 16)          # (C, H, W)
AVG_HIDDEN_LIST_REV = [16]         # dec_avg MLP hidden sizes (reversed)
RES_HIDDEN_LIST_REV = [32]         # dec_res MLP hidden sizes (reversed)
RES_CHANNEL_LIST_REV = [8, 16]     # conv-transpose input channels (reversed)
RES_KERNEL_LIST_REV = [4, 4]
RES_STRIDE_LIST_REV = [2, 2]
C0, H0, W0 = 16, 4, 4              # base feature map fed to the conv stack

N_AVG_H = AVG_HIDDEN_LIST_REV[0]   # 16
N_RES_H = RES_HIDDEN_LIST_REV[0]   # 32
CHW = IMAGE_SHAPE[0] * IMAGE_SHAPE[1] * IMAGE_SHAPE[2]   # 1024
N_RES_FLAT = C0 * H0 * W0                                 # 256
N_CT0_OUT = RES_CHANNEL_LIST_REV[0] * (2 * H0) * (2 * W0) # 512

MAX_B_BLK = 256                    # batch block (multiple of 8, VMEM-safe)


# ---------------------------------------------------------------------------
# The single fused Pallas kernel (runs once per batch block)
# ---------------------------------------------------------------------------
def _fused_decoder_kernel(x_ref, w0_ref, b0_ref, w1_ref, b1_ref,
                          ct0w_ref, ct0b_ref, ct1w_ref, ct1b_ref, o_ref):
    f32 = jnp.float32
    bf16 = jnp.bfloat16

    x = x_ref[...].astype(bf16)                                       # (Bb, K)

    # First layers of dec_avg and dec_res share x -> one concatenated matmul.
    h01 = jnp.dot(x, w0_ref[...], preferred_element_type=f32) + b0_ref[...]
    h01 = jnp.maximum(h01, 0.0)                                       # (Bb, 48)

    # Block-diagonal merge of the two second layers:
    #   cols [0, 1024)    = dec_avg last layer, H*W-broadcast + *0.5 + 0.5 folded
    #   cols [1024, 1280) = dec_res flatten layer
    h12 = jnp.dot(h01.astype(bf16), w1_ref[...],
                  preferred_element_type=f32) + b1_ref[...]           # (Bb, 1280)
    avg = h12[:, :CHW]                                                # lane-aligned
    h2 = h12[:, CHW:]                                                 # (Bb, 256)

    # ConvTranspose2d stack, each folded into a dense matmul.
    h3 = jnp.dot(h2.astype(bf16), ct0w_ref[...],
                 preferred_element_type=f32) + ct0b_ref[...]          # (Bb, 512)
    h3 = jnp.maximum(h3, 0.0)
    x_res = jnp.dot(h3.astype(bf16), ct1w_ref[...],
                    preferred_element_type=f32) + ct1b_ref[...]       # (Bb, 1024)

    # Epilogue: "+1" and "*0.5" already folded into the weights above.
    o_ref[...] = (avg + x_res).astype(o_ref.dtype)


def decoder_residual_forward(prep, x):
    """x: (B, in_features) -> (B, C, H, W)."""
    B, K = x.shape
    C, H, W = IMAGE_SHAPE

    b_blk = B if B <= MAX_B_BLK else MAX_B_BLK
    n_blk = -(-B // b_blk)
    Bp = n_blk * b_blk
    xp = x if Bp == B else jnp.pad(x, ((0, Bp - B), (0, 0)))

    weights = (prep["w0"], prep["b0"], prep["w1"], prep["b1"],
               prep["ct0_w"], prep["ct0_b"], prep["ct1_w"], prep["ct1_b"])

    def const_spec(a):
        # Full-array block, constant index_map: DMA'd once, VMEM-resident.
        return pl.BlockSpec(a.shape, lambda i, nd=a.ndim: (0,) * nd)

    flops = 2 * Bp * (K * (N_AVG_H + N_RES_H)
                      + (N_AVG_H + N_RES_H) * (CHW + N_RES_FLAT)
                      + N_RES_FLAT * N_CT0_OUT
                      + N_CT0_OUT * CHW)
    w_bytes = sum(int(a.size) * a.dtype.itemsize for a in weights)
    io_bytes = Bp * (K + CHW) * 4
    ce = pl.CostEstimate(flops=flops, transcendentals=0,
                         bytes_accessed=w_bytes + io_bytes)

    out = pl.pallas_call(
        _fused_decoder_kernel,
        out_shape=jax.ShapeDtypeStruct((Bp, CHW), jnp.float32),
        grid_spec=pltpu.PrefetchScalarGridSpec(
            num_scalar_prefetch=0,
            grid=(n_blk,),
            in_specs=[pl.BlockSpec((b_blk, K), lambda i: (i, 0))]
                     + [const_spec(a) for a in weights],
            out_specs=pl.BlockSpec((b_blk, CHW), lambda i: (i, 0)),
        ),
        compiler_params=pltpu.CompilerParams(
            dimension_semantics=("parallel",),          # v7x 2-TC sharding
            vmem_limit_bytes=48 * 1024 * 1024),
        cost_estimate=ce,
    )(xp, *weights)

    if Bp != B:
        out = out[:B]
    # Flat order is already (c, h, w)-major -> reshape is free (no transpose).
    return out.reshape(B, C, H, W)


# ---------------------------------------------------------------------------
# One-time parameter preparation (plain JAX, run once outside jit)
# ---------------------------------------------------------------------------
def _convt_to_dense(w, b, stride, padding, in_hw):
    """Fold a PyTorch-semantics ConvTranspose2d into a dense matrix + flat bias.

    w: (C_in, C_out, kH, kW);  returns ((C_in*H_in*W_in, C_out*H_out*W_out),
    (C_out*H_out*W_out,), (H_out, W_out)).
    """
    C_in, C_out, kH, kW = w.shape
    H_in, W_in = in_hw
    H_out = (H_in - 1) * stride - 2 * padding + kH
    W_out = (W_in - 1) * stride - 2 * padding + kW
    n_in = C_in * H_in * W_in

    # Apply the conv-transpose (as dilated correlation with the flipped kernel)
    # to the identity basis to materialize the dense operator.
    eye = jnp.eye(n_in, dtype=jnp.float32).reshape(n_in, C_in, H_in, W_in)
    w_corr = jnp.flip(w, (2, 3)).transpose(1, 0, 2, 3)        # (C_out, C_in, kH, kW)
    out = lax.conv_general_dilated(
        eye, w_corr,
        window_strides=(1, 1),
        padding=[(kH - 1 - padding, kH - 1 - padding),
                 (kW - 1 - padding, kW - 1 - padding)],
        lhs_dilation=(stride, stride),
        dimension_numbers=("NCHW", "OIHW", "NCHW"))
    dense = out.reshape(n_in, C_out * H_out * W_out)
    b_flat = jnp.repeat(b, H_out * W_out)                      # (c, h, w)-major
    return dense, b_flat, (H_out, W_out)


def prepare_params(p):
    """Fold / concatenate raw module params into the fused-kernel layout."""
    C, H, W = IMAGE_SHAPE
    f32, bf16 = jnp.float32, jnp.bfloat16
    prep = {}

    # Concatenate the two first-layer Linears (they share the same input x).
    prep["w0"] = jnp.concatenate([p["avg_w0"], p["res_w0"]], axis=1).astype(bf16)  # (K, 48)
    prep["b0"] = jnp.concatenate([p["avg_b0"], p["res_b0"]])[None, :].astype(f32)  # (1, 48)

    # dec_avg last layer: fold the [..., None, None] broadcast over H*W and the
    # epilogue's *0.5 / +0.5 into the weight & bias.
    E = jnp.kron(jnp.eye(C, dtype=f32), jnp.ones((1, H * W), f32))     # (C, C*H*W)
    avg_w1e = 0.5 * (p["avg_w1"] @ E)                                  # (16, CHW)
    avg_b1e = 0.5 * (p["avg_b1"] @ E) + 0.5                            # (CHW,)

    # Block-diagonal merge with dec_res's flatten layer -> one (48,1280) matmul.
    w1c = jnp.zeros((N_AVG_H + N_RES_H, CHW + N_RES_FLAT), f32)
    w1c = w1c.at[:N_AVG_H, :CHW].set(avg_w1e)
    w1c = w1c.at[N_AVG_H:, CHW:].set(p["res_w1"])
    prep["w1"] = w1c.astype(bf16)                                       # (48, 1280)
    prep["b1"] = jnp.concatenate([avg_b1e, p["res_b1"]])[None, :].astype(f32)

    # Fold both ConvTranspose2d layers into dense matmuls (bf16 weights,
    # epilogue's *0.5 folded into the last one).
    w, bflat, hw1 = _convt_to_dense(p["ct0_w"], p["ct0_b"],
                                    RES_STRIDE_LIST_REV[1], 1, (H0, W0))
    prep["ct0_w"], prep["ct0_b"] = w.astype(bf16), bflat[None, :].astype(f32)
    w, bflat, _ = _convt_to_dense(p["ct1_w"], p["ct1_b"],
                                  RES_STRIDE_LIST_REV[0], 1, hw1)
    prep["ct1_w"] = (0.5 * w).astype(bf16)                              # (512, 1024)
    prep["ct1_b"] = (0.5 * bflat)[None, :].astype(f32)                  # (1, 1024)
    return prep


# ---------------------------------------------------------------------------
# Deterministic parameter init (shapes implied by the module's __init__)
# ---------------------------------------------------------------------------
def init_params(key):
    def linear(key, fan_in, fan_out):
        k1, k2 = jax.random.split(key)
        w = jax.random.normal(k1, (fan_in, fan_out), jnp.float32) / jnp.sqrt(fan_in)
        b = 0.01 * jax.random.normal(k2, (fan_out,), jnp.float32)
        return w, b   # stored as (in, out) == W.T of the PyTorch nn.Linear weight

    def convt(key, c_in, c_out, k):
        k1, k2 = jax.random.split(key)
        w = jax.random.normal(k1, (c_in, c_out, k, k), jnp.float32) / jnp.sqrt(c_in * k * k)
        b = 0.01 * jax.random.normal(k2, (c_out,), jnp.float32)
        return w, b

    keys = jax.random.split(key, 6)
    p = {}
    p["avg_w0"], p["avg_b0"] = linear(keys[0], IN_FEATURES, AVG_HIDDEN_LIST_REV[0])
    p["avg_w1"], p["avg_b1"] = linear(keys[1], AVG_HIDDEN_LIST_REV[0], IMAGE_SHAPE[0])
    p["res_w0"], p["res_b0"] = linear(keys[2], IN_FEATURES, RES_HIDDEN_LIST_REV[0])
    p["res_w1"], p["res_b1"] = linear(keys[3], RES_HIDDEN_LIST_REV[0], C0 * H0 * W0)
    p["ct0_w"], p["ct0_b"] = convt(keys[4], 16, 8, RES_KERNEL_LIST_REV[1])
    p["ct1_w"], p["ct1_b"] = convt(keys[5], 8, IMAGE_SHAPE[0], RES_KERNEL_LIST_REV[0])
    return p


# ---------------------------------------------------------------------------
# Pure-JAX f32 reference (no Pallas, no folding), for a correctness check
# ---------------------------------------------------------------------------
def _ref_forward(params, x):
    def lin(h, w, b, relu=False):
        h = h @ w + b
        return jnp.maximum(h, 0.0) if relu else h

    def convt(h, w, b, stride, padding, relu):
        k = w.shape[2]
        o = lax.conv_general_dilated(
            h, jnp.flip(w, (2, 3)).transpose(1, 0, 2, 3),
            window_strides=(1, 1),
            padding=[(k - 1 - padding,) * 2, (k - 1 - padding,) * 2],
            lhs_dilation=(stride, stride),
            dimension_numbers=("NCHW", "OIHW", "NCHW"))
        o = o + b[None, :, None, None]
        return jnp.maximum(o, 0.0) if relu else o

    B = x.shape[0]
    x_avg = lin(lin(x, params["avg_w0"], params["avg_b0"], True),
                params["avg_w1"], params["avg_b1"])[..., None, None]
    h = lin(lin(x, params["res_w0"], params["res_b0"], True),
            params["res_w1"], params["res_b1"]).reshape(B, C0, H0, W0)
    h = convt(h, params["ct0_w"], params["ct0_b"], RES_STRIDE_LIST_REV[1], 1, True)
    x_res = convt(h, params["ct1_w"], params["ct1_b"], RES_STRIDE_LIST_REV[0], 1, False)
    return (x_avg + x_res + 1.0) * 0.5


if __name__ == "__main__":
    key = jax.random.PRNGKey(0)
    pkey, xkey = jax.random.split(key)
    params = init_params(pkey)
    prep = prepare_params(params)            # one-time fold, outside jit
    x = jax.random.normal(xkey, (2, IN_FEATURES), jnp.float32)

    fwd = jax.jit(decoder_residual_forward)
    y = jax.block_until_ready(fwd(prep, x))

    assert y.shape == (2,) + IMAGE_SHAPE, y.shape
    assert bool(jnp.all(jnp.isfinite(y)))

    # Parity against the un-fused f32 plain-JAX reference (bf16 weights in the
    # kernel with f32 accumulation -> slightly looser tolerance).
    y_ref = _ref_forward(params, x)
    err = float(jnp.max(jnp.abs(y - y_ref)))
    assert err < 5e-2, err

    print("KERNEL_OK")
</pallas_src>

<mosaic_0001>
module attributes {stable_mosaic.version = 11 : i64} {
  func.func @_fused_decoder_kernel(%arg0: i32, %arg1: memref<2x32xf32, #tpu.memory_space<vmem>>, %arg2: memref<32x48xbf16, #tpu.memory_space<vmem>>, %arg3: memref<1x48xf32, #tpu.memory_space<vmem>>, %arg4: memref<48x1280xbf16, #tpu.memory_space<vmem>>, %arg5: memref<1x1280xf32, #tpu.memory_space<vmem>>, %arg6: memref<256x512xbf16, #tpu.memory_space<vmem>>, %arg7: memref<1x512xf32, #tpu.memory_space<vmem>>, %arg8: memref<512x1024xbf16, #tpu.memory_space<vmem>>, %arg9: memref<1x1024xf32, #tpu.memory_space<vmem>>, %arg10: memref<2x1024xf32, #tpu.memory_space<vmem>>) attributes {dimension_semantics = [#tpu.dimension_semantics<parallel>], iteration_bounds = array<i64: 1>, scalar_prefetch = 0 : i64, scratch_operands = 0 : i64, tpu.core_type = #tpu.core_type<tc>, window_params = [{transform_indices = @transform_0, window_bounds = array<i64: 2, 32>}, {pipeline_mode = #tpu.pipeline_mode<synchronous>, transform_indices = @transform_1, window_bounds = array<i64: 32, 48>}, {pipeline_mode = #tpu.pipeline_mode<synchronous>, transform_indices = @transform_2, window_bounds = array<i64: 1, 48>}, {pipeline_mode = #tpu.pipeline_mode<synchronous>, transform_indices = @transform_3, window_bounds = array<i64: 48, 1280>}, {pipeline_mode = #tpu.pipeline_mode<synchronous>, transform_indices = @transform_4, window_bounds = array<i64: 1, 1280>}, {pipeline_mode = #tpu.pipeline_mode<synchronous>, transform_indices = @transform_5, window_bounds = array<i64: 256, 512>}, {pipeline_mode = #tpu.pipeline_mode<synchronous>, transform_indices = @transform_6, window_bounds = array<i64: 1, 512>}, {pipeline_mode = #tpu.pipeline_mode<synchronous>, transform_indices = @transform_7, window_bounds = array<i64: 512, 1024>}, {pipeline_mode = #tpu.pipeline_mode<synchronous>, transform_indices = @transform_8, window_bounds = array<i64: 1, 1024>}, {transform_indices = @transform_9, window_bounds = array<i64: 2, 1024>}]} {
    %c0 = arith.constant 0 : index
    %c0_0 = arith.constant 0 : index
    %0 = vector.load %arg1[%c0, %c0_0] : memref<2x32xf32, #tpu.memory_space<vmem>>, vector<2x32xf32>
    %1 = arith.truncf %0 : vector<2x32xf32> to vector<2x32xbf16>
    %c0_1 = arith.constant 0 : index
    %c0_2 = arith.constant 0 : index
    %2 = vector.load %arg2[%c0_1, %c0_2] : memref<32x48xbf16, #tpu.memory_space<vmem>>, vector<32x48xbf16>
    %cst = arith.constant dense<0.000000e+00> : vector<2x48xf32>
    %3 = tpu.matmul %1, %2, %cst {dimension_numbers = #tpu.dot_dimension_numbers<[1], [0], [0], [1], [0, 0, 1, 1], [], []>} : vector<2x32xbf16>, vector<32x48xbf16>, vector<2x48xf32> -> vector<2x48xf32>
    %c0_3 = arith.constant 0 : index
    %c0_4 = arith.constant 0 : index
    %4 = vector.load %arg3[%c0_3, %c0_4] : memref<1x48xf32, #tpu.memory_space<vmem>>, vector<1x48xf32>
    %5 = vector.broadcast %4 : vector<1x48xf32> to vector<2x48xf32>
    %6 = arith.addf %3, %5 : vector<2x48xf32>
    %cst_5 = arith.constant 0.000000e+00 : f32
    %7 = vector.broadcast %cst_5 : f32 to vector<2x48xf32>
    %8 = arith.maximumf %6, %7 : vector<2x48xf32>
    %9 = arith.truncf %8 : vector<2x48xf32> to vector<2x48xbf16>
    %c0_6 = arith.constant 0 : index
    %c0_7 = arith.constant 0 : index
    %10 = vector.load %arg4[%c0_6, %c0_7] : memref<48x1280xbf16, #tpu.memory_space<vmem>>, vector<48x1280xbf16>
    %cst_8 = arith.constant dense<0.000000e+00> : vector<2x1280xf32>
    %11 = tpu.matmul %9, %10, %cst_8 {dimension_numbers = #tpu.dot_dimension_numbers<[1], [0], [0], [1], [0, 0, 1, 1], [], []>} : vector<2x48xbf16>, vector<48x1280xbf16>, vector<2x1280xf32> -> vector<2x1280xf32>
    %c0_9 = arith.constant 0 : index
    %c0_10 = arith.constant 0 : index
    %12 = vector.load %arg5[%c0_9, %c0_10] : memref<1x1280xf32, #tpu.memory_space<vmem>>, vector<1x1280xf32>
    %13 = vector.broadcast %12 : vector<1x1280xf32> to vector<2x1280xf32>
    %14 = arith.addf %11, %13 : vector<2x1280xf32>
    %15 = vector.extract_strided_slice %14 {offsets = [0, 0], sizes = [2, 1024], strides = [1, 1]} : vector<2x1280xf32> to vector<2x1024xf32>
    %16 = vector.extract_strided_slice %14 {offsets = [0, 1024], sizes = [2, 256], strides = [1, 1]} : vector<2x1280xf32> to vector<2x256xf32>
    %17 = arith.truncf %16 : vector<2x256xf32> to vector<2x256xbf16>
    %c0_11 = arith.constant 0 : index
    %c0_12 = arith.constant 0 : index
    %18 = vector.load %arg6[%c0_11, %c0_12] : memref<256x512xbf16, #tpu.memory_space<vmem>>, vector<256x512xbf16>
    %cst_13 = arith.constant dense<0.000000e+00> : vector<2x512xf32>
    %19 = tpu.matmul %17, %18, %cst_13 {dimension_numbers = #tpu.dot_dimension_numbers<[1], [0], [0], [1], [0, 0, 1, 1], [], []>} : vector<2x256xbf16>, vector<256x512xbf16>, vector<2x512xf32> -> vector<2x512xf32>
    %c0_14 = arith.constant 0 : index
    %c0_15 = arith.constant 0 : index
    %20 = vector.load %arg7[%c0_14, %c0_15] : memref<1x512xf32, #tpu.memory_space<vmem>>, vector<1x512xf32>
    %21 = vector.broadcast %20 : vector<1x512xf32> to vector<2x512xf32>
    %22 = arith.addf %19, %21 : vector<2x512xf32>
    %cst_16 = arith.constant 0.000000e+00 : f32
    %23 = vector.broadcast %cst_16 : f32 to vector<2x512xf32>
    %24 = arith.maximumf %22, %23 : vector<2x512xf32>
    %25 = arith.truncf %24 : vector<2x512xf32> to vector<2x512xbf16>
    %c0_17 = arith.constant 0 : index
    %c0_18 = arith.constant 0 : index
    %26 = vector.load %arg8[%c0_17, %c0_18] : memref<512x1024xbf16, #tpu.memory_space<vmem>>, vector<512x1024xbf16>
    %cst_19 = arith.constant dense<0.000000e+00> : vector<2x1024xf32>
    %27 = tpu.matmul %25, %26, %cst_19 {dimension_numbers = #tpu.dot_dimension_numbers<[1], [0], [0], [1], [0, 0, 1, 1], [], []>} : vector<2x512xbf16>, vector<512x1024xbf16>, vector<2x1024xf32> -> vector<2x1024xf32>
    %c0_20 = arith.constant 0 : index
    %c0_21 = arith.constant 0 : index
    %28 = vector.load %arg9[%c0_20, %c0_21] : memref<1x1024xf32, #tpu.memory_space<vmem>>, vector<1x1024xf32>
    %29 = vector.broadcast %28 : vector<1x1024xf32> to vector<2x1024xf32>
    %30 = arith.addf %27, %29 : vector<2x1024xf32>
    %31 = arith.addf %15, %30 : vector<2x1024xf32>
    %c0_22 = arith.constant 0 : index
    %c0_23 = arith.constant 0 : index
    %32 = vector.load %arg10[%c0_22, %c0_23] : memref<2x1024xf32, #tpu.memory_space<vmem>>, vector<2x1024xf32>
    tpu.vector_store %arg10[%c0_22, %c0_23], %31 {strides = array<i32>} : memref<2x1024xf32, #tpu.memory_space<vmem>>, vector<2x1024xf32>,
    return
  }
  func.func @transform_0(%arg0: i32) -> (i32, i32) {
    %c0_i32 = arith.constant 0 : i32
    %c0_i32_0 = arith.constant 0 : i32
    return %arg0, %c0_i32 : i32, i32
  }
  func.func @transform_1(%arg0: i32) -> (i32, i32) {
    %c0_i32 = arith.constant 0 : i32
    %c0_i32_0 = arith.constant 0 : i32
    %c0_i32_1 = arith.constant 0 : i32
    return %c0_i32, %c0_i32_0 : i32, i32
  }
  func.func @transform_2(%arg0: i32) -> (i32, i32) {
    %c0_i32 = arith.constant 0 : i32
    %c0_i32_0 = arith.constant 0 : i32
    %c0_i32_1 = arith.constant 0 : i32
    return %c0_i32, %c0_i32_0 : i32, i32
  }
  func.func @transform_3(%arg0: i32) -> (i32, i32) {
    %c0_i32 = arith.constant 0 : i32
    %c0_i32_0 = arith.constant 0 : i32
    %c0_i32_1 = arith.constant 0 : i32
    return %c0_i32, %c0_i32_0 : i32, i32
  }
  func.func @transform_4(%arg0: i32) -> (i32, i32) {
    %c0_i32 = arith.constant 0 : i32
    %c0_i32_0 = arith.constant 0 : i32
    %c0_i32_1 = arith.constant 0 : i32
    return %c0_i32, %c0_i32_0 : i32, i32
  }
  func.func @transform_5(%arg0: i32) -> (i32, i32) {
    %c0_i32 = arith.constant 0 : i32
    %c0_i32_0 = arith.constant 0 : i32
    %c0_i32_1 = arith.constant 0 : i32
    return %c0_i32, %c0_i32_0 : i32, i32
  }
  func.func @transform_6(%arg0: i32) -> (i32, i32) {
    %c0_i32 = arith.constant 0 : i32
    %c0_i32_0 = arith.constant 0 : i32
    %c0_i32_1 = arith.constant 0 : i32
    return %c0_i32, %c0_i32_0 : i32, i32
  }
  func.func @transform_7(%arg0: i32) -> (i32, i32) {
    %c0_i32 = arith.constant 0 : i32
    %c0_i32_0 = arith.constant 0 : i32
    %c0_i32_1 = arith.constant 0 : i32
    return %c0_i32, %c0_i32_0 : i32, i32
  }
  func.func @transform_8(%arg0: i32) -> (i32, i32) {
    %c0_i32 = arith.constant 0 : i32
    %c0_i32_0 = arith.constant 0 : i32
    %c0_i32_1 = arith.constant 0 : i32
    return %c0_i32, %c0_i32_0 : i32, i32
  }
  func.func @transform_9(%arg0: i32) -> (i32, i32) {
    %c0_i32 = arith.constant 0 : i32
    %c0_i32_0 = arith.constant 0 : i32
    return %arg0, %c0_i32 : i32, i32
  }
}

</mosaic_0001>

<bundles_post_ra>
// kernel: decoder_residual_forward.1
= control target key start
LH: loop header
LB: loop body
LE: loop exit
PB: predicated region body
PF: predicated region fallthrough
CT: control target
= control target key end

     0   :  { %14 = vsyncpa [#allocation3], 0  ;;  %s4033_s0 = inlined_call_operand.vmem [shape: f32[2,32], index: 0, kind: input, shape index: {}]   ;;  %s4034_s1 = inlined_call_operand.vmem [shape: bf16[32,48], index: 1, kind: input, shape index: {}]   ;;  %s4035_s2 = inlined_call_operand.hbm [shape: f32[1,48], index: 2, kind: input, shape index: {}]   ;;  %s4036_s3 = inlined_call_operand.hbm [shape: bf16[48,1280], index: 3, kind: input, shape index: {}]   ;;  %s4037_s4 = inlined_call_operand.hbm [shape: f32[1,1280], index: 4, kind: input, shape index: {}]   ;;  %s4038_s5 = inlined_call_operand.hbm [shape: bf16[256,512], index: 5, kind: input, shape index: {}]   ;;  %s4039_s6 = inlined_call_operand.vmem [shape: f32[1,512], index: 6, kind: input, shape index: {}]   ;;  %s4040_s7 = inlined_call_operand.hbm [shape: bf16[512,1024], index: 7, kind: input, shape index: {}]   ;;  %s4041_s8 = inlined_call_operand.hbm [shape: f32[1,1024], index: 8, kind: input, shape index: {}]   ;;  %s4042_s9 = inlined_call_operand.vmem [shape: f32[2,1024], index: 9, kind: output, shape index: {}]  }
   0x1   :  { %15 = vsyncpa [#allocation5], 0 }
   0x2   :  { %16 = vsyncpa [#allocation8], 0 }
   0x3   :  { %17 = vsyncpa [#allocation11], 0  ;;  %s3806_s30 = smov [#allocation4]   ;;  %s3666_s13 = scalar_lea.hbm %s4036_s3, 3840 }
   0x4   :  { %s37_s10 = sshll.u32 %s3806_s30, 4  ;;  %p3667_p0 = scmp.ne.s32.totalorder %s4036_s3, %s3666_s13  ;;  %s38_s10 = int_to_ptr.vmem [resolvable:$true] %s37_s10 }
   0x5   :  { %p3670_p1 = scmp.lt.u32.totalorder %s3666_s13, %s4036_s3 }
   0x7   :  { %p3672_p2 = pnand %p3670_p1, %p3667_p0 }
   0x9   :  { %3675 = shalt.err (!%p3672_p2)
}
   0xa   :  { %s3676_s18 = scalar_lea.vmem %s38_s10, 3840  ;;  %p3681_p4 = scmp.lt.s32.totalorder %s38_s10, %s38_s10 }
   0xb   :  { %p3677_p3 = scmp.ne.s32.totalorder %s38_s10, %s3676_s18  ;;  %p3682_p5 = scmp.lt.s32.totalorder %s3676_s18, %s3676_s18 }
   0xd   :  { %p3683_p6 = por %p3682_p5, %p3681_p4 }
   0xf   :  { %p3684_p7 = pnand %p3683_p6, %p3677_p3 }
  0x11   :  { %3687 = shalt.err (!%p3684_p7)
}
  0x12   :  { %s3807_s19 = smov 640   ;;  %s3808_s20 = smov 40  }
  0x13   :  { %43 = dma.hbm_to_vmem [thread:$0]  %s4036_s3, 3840, %s38_s10, [#allocation5], %s3807_s19, %s3807_s19, %s3808_s20  }
  0x14   :  { %s3809_s23 = smov [#allocation7]   ;;  %s3688_s27 = scalar_lea.hbm %s4038_s5, 8192 }
  0x15   :  { %s59_s24 = sshll.u32 %s3809_s23, 4  ;;  %p3689_p8 = scmp.ne.s32.totalorder %s4038_s5, %s3688_s27  ;;  %s60_s24 = int_to_ptr.vmem [resolvable:$true] %s59_s24 }
  0x16   :  { %p3692_p9 = scmp.lt.u32.totalorder %s3688_s27, %s4038_s5 }
  0x18   :  { %p3694_p10 = pnand %p3692_p9, %p3689_p8 }
  0x1a   :  { %3697 = shalt.err (!%p3694_p10)
}
  0x1b   :  { %s3698_s12 = scalar_lea.vmem %s60_s24, 8192  ;;  %p3703_p12 = scmp.lt.s32.totalorder %s60_s24, %s60_s24 }
  0x1c   :  { %p3699_p11 = scmp.ne.s32.totalorder %s60_s24, %s3698_s12  ;;  %p3704_p13 = scmp.lt.s32.totalorder %s3698_s12, %s3698_s12 }
  0x1e   :  { %p3705_p0 = por %p3704_p13, %p3703_p12 }
  0x20   :  { %p3706_p1 = pnand %p3705_p0, %p3699_p11 }
  0x22   :  { %3709 = shalt.err (!%p3706_p1)
}
  0x23   :  { %s3810_s3 = smov 256   ;;  %s3811_s10 = smov 16  }
  0x24   :  { %65 = dma.hbm_to_vmem [thread:$0]  %s4038_s5, 8192, %s60_s24, [#allocation8], %s3810_s3, %s3810_s3, %s3811_s10  }
  0x25   :  { %s3812_s15 = smov [#allocation2]   ;;  %s3813_s17 = smov [#allocation6]  }
  0x26   :  { %s28_s16 = sshll.u32 %s3812_s15, 4  ;;  %s50_s18 = sshll.u32 %s3813_s17, 4  ;;  %s29_s16 = int_to_ptr.vmem [resolvable:$true] %s28_s16  ;;  %s51_s18 = int_to_ptr.vmem [resolvable:$true] %s50_s18 }
  0x27   :  { %s3710_s21 = scalar_lea.hbm %s4035_s2, 16 }
  0x28   :  { %p3711_p2 = scmp.ne.s32.totalorder %s4035_s2, %s3710_s21  ;;  %p3714_p3 = scmp.lt.u32.totalorder %s3710_s21, %s4035_s2 }
  0x2a   :  { %p3716_p4 = pnand %p3714_p3, %p3711_p2 }
  0x2c   :  { %3719 = shalt.err (!%p3716_p4)
}
  0x2d   :  { %s3720_s5 = scalar_lea.vmem %s29_s16, 16  ;;  %s3724_s24 = scalar_lea.vmem %s29_s16, 32 }
  0x2e   :  { %p3721_p5 = scmp.ne.s32.totalorder %s29_s16, %s3720_s5  ;;  %p3725_p6 = scmp.lt.s32.totalorder %s29_s16, %s29_s16 }
  0x2f   :  { %p3726_p7 = scmp.lt.s32.totalorder %s3724_s24, %s3720_s5 }
  0x31   :  { %p3727_p8 = por %p3726_p7, %p3725_p6 }
  0x33   :  { %p3728_p9 = pnand %p3727_p8, %p3721_p5 }
  0x35   :  { %3731 = shalt.err (!%p3728_p9)
}
  0x36   :  { %31 = dma.hbm_to_vmem [thread:$0]  %s4035_s2, 16, %s29_s16, [#allocation3]  }
  0x37   :  { %s3732_s11 = scalar_lea.hbm %s4037_s4, 160 }
  0x38   :  { %p3733_p10 = scmp.ne.s32.totalorder %s4037_s4, %s3732_s11  ;;  %p3736_p11 = scmp.lt.u32.totalorder %s3732_s11, %s4037_s4 }
  0x3a   :  { %p3738_p12 = pnand %p3736_p11, %p3733_p10 }
  0x3c   :  { %3741 = shalt.err (!%p3738_p12)
}
  0x3d   :  { %s3742_s14 = scalar_lea.vmem %s51_s18, 160  ;;  %p3747_p0 = scmp.lt.s32.totalorder %s51_s18, %s51_s18 }
  0x3e   :  { %p3743_p13 = scmp.ne.s32.totalorder %s51_s18, %s3742_s14  ;;  %p3748_p1 = scmp.lt.s32.totalorder %s3742_s14, %s3742_s14 }
  0x40   :  { %p3749_p2 = por %p3748_p1, %p3747_p0 }
  0x42   :  { %p3750_p3 = pnand %p3749_p2, %p3743_p13 }
  0x44   :  { %3753 = shalt.err (!%p3750_p3)
}
  0x45   :  { %53 = dma.hbm_to_vmem [thread:$0]  %s4037_s4, 160, %s51_s18, [#allocation5]  }
  0x46   :  { %s3814_s16 = smov [#allocation9]   ;;  %s3754_s21 = scalar_lea.hbm %s4040_s7, 32768 }
  0x47   :  { %s73_s17 = sshll.u32 %s3814_s16, 4  ;;  %p3755_p4 = scmp.ne.s32.totalorder %s4040_s7, %s3754_s21  ;;  %s74_s17 = int_to_ptr.vmem [resolvable:$true] %s73_s17 }
  0x48   :  { %p3758_p5 = scmp.lt.u32.totalorder %s3754_s21, %s4040_s7 }
  0x4a   :  { %p3760_p6 = pnand %p3758_p5, %p3755_p4 }
  0x4c   :  { %3763 = shalt.err (!%p3760_p6)
}
  0x4d   :  { %s3764_s5 = scalar_lea.vmem %s74_s17, 32768  ;;  %p3769_p8 = scmp.lt.s32.totalorder %s74_s17, %s74_s17 }
  0x4e   :  { %p3765_p7 = scmp.ne.s32.totalorder %s74_s17, %s3764_s5  ;;  %p3770_p9 = scmp.lt.s32.totalorder %s3764_s5, %s3764_s5 }
  0x50   :  { %p3771_p10 = por %p3770_p9, %p3769_p8 }
  0x52   :  { %p3772_p11 = pnand %p3771_p10, %p3765_p7 }
  0x54   :  { %3775 = shalt.err (!%p3772_p11)
}
  0x55   :  { %s3815_s4 = smov 512   ;;  %s3816_s18 = smov 32  }
  0x56   :  { %79 = dma.hbm_to_vmem [thread:$0]  %s4040_s7, 32768, %s74_s17, [#allocation8], %s3815_s4, %s3815_s4, %s3816_s18  }
  0x57   :  { %s3817_s28 = smov [#allocation10]   ;;  %s3776_s12 = scalar_lea.hbm %s4041_s8, 128 }
  0x58   :  { %s86_s29 = sshll.u32 %s3817_s28, 4  ;;  %p3777_p12 = scmp.ne.s32.totalorder %s4041_s8, %s3776_s12  ;;  %s87_s29 = int_to_ptr.vmem [resolvable:$true] %s86_s29 }
  0x59   :  { %p3780_p13 = scmp.lt.u32.totalorder %s3776_s12, %s4041_s8 }
  0x5b   :  { %p3782_p0 = pnand %p3780_p13, %p3777_p12 }
  0x5d   :  { %3785 = shalt.err (!%p3782_p0)
}
  0x5e   :  { %s3786_s2 = scalar_lea.vmem %s87_s29, 128  ;;  %p3791_p2 = scmp.lt.s32.totalorder %s87_s29, %s87_s29 }
  0x5f   :  { %p3787_p1 = scmp.ne.s32.totalorder %s87_s29, %s3786_s2  ;;  %p3792_p3 = scmp.lt.s32.totalorder %s3786_s2, %s3786_s2 }
  0x61   :  { %p3793_p4 = por %p3792_p3, %p3791_p2 }
  0x63   :  { %p3794_p5 = pnand %p3793_p4, %p3787_p1 }
  0x65   :  { %3797 = shalt.err (!%p3794_p5)
}
  0x66   :  { %89 = dma.hbm_to_vmem [thread:$0]  %s4041_s8, 128, %s87_s29, [#allocation11]  }
  0x67   :  { %3798 = dma.done.wait [#allocation3], 16  }
  0x68   :  { %3799 = vsyncadd [#allocation3], 4294967280 }
  0x69   :  { %3800 = dma.done.wait [#allocation5], 4000  }
  0x6a   :  { %3801 = vsyncadd [#allocation5], 4294963296 }
  0x6b   :  { %3802 = dma.done.wait [#allocation8], 40960  }
  0x6c   :  { %3803 = vsyncadd [#allocation8], 4294926336 }
  0x6d   :  { %3804 = dma.done.wait [#allocation11], 128  }
  0x6e   :  { %3805 = vsyncadd [#allocation11], 4294967168  ;;  %v3818_v0 = vmov 0.0   ;;  %vm3819_vm0 = vmmov 0   ;;  %v3523_v1 = vld [vmem:[%s4034_s1] sm:$0xff]   ;;  %v3524_v2 = vld [vmem:[%s4034_s1 + $0x8] sm:$0xff]  }
  0x6f   :  { %3451 = vmatprep.subr.bf16.mxu0 %v3818_v0  ;;  %3455 = vmatprep.mubr.msk.bf16.mxu0 %vm3819_vm0, %v3818_v0  ;;  %v109_v3 = vld [vmem:[%s4033_s0] sm:$0x3]  ;;  %v3530_v6 = vld [vmem:[#allocation4] ss:$40 sps:$4 sm:$0xff]   ;;  %v3531_v8 = vld [vmem:[#allocation4 + $0x54] ss:$40 sps:$4 sm:$0xff]  }
  0x70   :  { %3452 = vmatpush3.bf16.msra.mxu0 %v3523_v1  ;;  %v3525_v4 = vld [vmem:[#allocation4 + $0x4] ss:$40 sps:$4 sm:$0xff]   ;;  %v110_v7 = vpack.c.bf16 %v109_v3, %v109_v3  ;;  %vm134_vm1 = vcmask 261120   ;;  %v3527_v9 = vld [vmem:[#allocation4 + $0x8] ss:$40 sps:$4 sm:$0xff]   ;;  %v3820_v19 = vmov 0  }
  0x71   :  { %3453 = vmatprep.subr.bf16.mxu0 %v3818_v0  ;;  %v3529_v5 = vld [vmem:[#allocation4 + $0xc] ss:$40 sps:$4 sm:$0xff]   ;;  %418 = vmatprep.subr.bf16.mxu1 %v3525_v4  ;;  %v3535_v10 = vld [vmem:[#allocation4 + $0x5c] ss:$40 sps:$4 sm:$0xff]   ;;  %v3536_v11 = vld [vmem:[#allocation4 + $0x50] ss:$40 sps:$4 sm:$0xff]  }
  0x72   :  { %419 = vmatpush1.bf16.msra.mxu1 %v3530_v6  ;;  %v3533_v12 = vld [vmem:[#allocation4 + $0x58] ss:$40 sps:$4 sm:$0xff]   ;;  %v3537_v13 = vld [vmem:[#allocation4 + $0xa4] ss:$40 sps:$4 sm:$0xff]   ;;  %v3539_v15 = vld [vmem:[#allocation4 + $0xa8] ss:$40 sps:$4 sm:$0xff]   ;;  %450 = vmatprep.mubr.bf16.mxu1 %v3820_v19 }
  0x73   :  { %420 = vmatprep.subr.bf16.mxu1 %v3531_v8  ;;  %v3541_v14 = vld [vmem:[#allocation4 + $0xac] ss:$40 sps:$4 sm:$0xff]   ;;  %v3542_v16 = vld [vmem:[#allocation4 + $0xa0] ss:$40 sps:$4 sm:$0xff]   ;;  %v3548_v18 = vld [vmem:[#allocation4 + $0x1c] ss:$40 sps:$4 sm:$0xff]  }
  0x74   :  { %3454 = vmatpush3.bf16.msra.mxu0 %v3524_v2  ;;  %v3545_v17 = vld [vmem:[#allocation4 + $0x14] ss:$40 sps:$4 sm:$0xff]   ;;  %v3543_v27 = vld [vmem:[#allocation4 + $0x10] ss:$40 sps:$4 sm:$0xff]   ;;  %vm414_vm2 = vcmask 392192  }
  0x75   :  { %459 = vmatprep.subr.bf16.mxu0 %v3529_v5  ;;  %v3089_v20 = vld [vmem:[#allocation2] ss:$0 sm:$0xff]  ;;  %v3546_v28 = vld [vmem:[#allocation4 + $0x18] ss:$40 sps:$4 sm:$0xff]   ;;  %v3551_v30 = vld [vmem:[#allocation4 + $0x64] ss:$40 sps:$4 sm:$0xff]  }
  0x76   :  { %421 = vmatpush1.bf16.msra.mxu1 %v3536_v11  ;;  %v3554_v31 = vld [vmem:[#allocation4 + $0x6c] ss:$40 sps:$4 sm:$0xff]   ;;  %v3549_v32 = vld [vmem:[#allocation4 + $0x60] ss:$40 sps:$4 sm:$0xff]   ;;  %v3560_v35 = vld [vmem:[#allocation4 + $0xbc] ss:$40 sps:$4 sm:$0xff]  }
  0x77   :  { %3456 = vmatmul.mubr.msk.bf16.vlgmr.msra.gmra.mrb[0].mxu0 %vm134_vm1, %v110_v7  ;;  %422 = vmatprep.subr.bf16.mxu1 %v3537_v13  ;;  %v3552_v33 = vld [vmem:[#allocation4 + $0x68] ss:$40 sps:$4 sm:$0xff]   ;;  %v3557_v34 = vld [vmem:[#allocation4 + $0xb4] ss:$40 sps:$4 sm:$0xff]   ;;  %v3558_v37 = vld [vmem:[#allocation4 + $0xb8] ss:$40 sps:$4 sm:$0xff]  }
  0x78   :  { %460 = vmatpush1.bf16.msra.mxu0 %v3527_v9  ;;  %491 = vmatprep.mubr.bf16.mxu0 %v3820_v19  ;;  %v3555_v36 = vld [vmem:[#allocation4 + $0xb0] ss:$40 sps:$4 sm:$0xff]   ;;  %v3563_v38 = vld [vmem:[#allocation4 + $0x24] ss:$40 sps:$4 sm:$0xff]   ;;  %v3561_v40 = vld [vmem:[#allocation4 + $0x20] ss:$40 sps:$4 sm:$0xff]  }
  0x79   :  { %461 = vmatprep.subr.bf16.mxu0 %v3535_v10  ;;  %v3572_v39 = vld [vmem:[#allocation7 + $0x4] ss:$16 sps:$4 sm:$0xff]   ;;  %v3570_v42 = vld [vmem:[#allocation7] ss:$16 sps:$4 sm:$0xff]   ;;  %v3575_v49 = vld [vmem:[#allocation7 + $0xc] ss:$16 sps:$4 sm:$0xff]  }
  0x7a   :  { %423 = vmatpush1.bf16.msra.mxu1 %v3542_v16  ;;  %v3566_v41 = vld [vmem:[#allocation4 + $0x74] ss:$40 sps:$4 sm:$0xff]   ;;  %v3564_v44 = vld [vmem:[#allocation4 + $0x70] ss:$40 sps:$4 sm:$0xff]   ;;  %v3569_v45 = vld [vmem:[#allocation4 + $0xc4] ss:$40 sps:$4 sm:$0xff]  }
  0x7b   :  { %500 = vmatprep.subr.bf16.mxu1 %v3545_v17  ;;  %v3578_v43 = vld [vmem:[#allocation7 + $0x24] ss:$16 sps:$4 sm:$0xff]   ;;  %v3576_v46 = vld [vmem:[#allocation7 + $0x20] ss:$16 sps:$4 sm:$0xff]   ;;  %v3573_v52 = vld [vmem:[#allocation7 + $0x8] ss:$16 sps:$4 sm:$0xff]  }
  0x7c   :  { %462 = vmatpush1.bf16.msra.mxu0 %v3533_v12  ;;  %v3584_v47 = vld [vmem:[#allocation7 + $0x44] ss:$16 sps:$4 sm:$0xff]   ;;  %v3582_v50 = vld [vmem:[#allocation7 + $0x40] ss:$16 sps:$4 sm:$0xff]   ;;  %v3581_v53 = vld [vmem:[#allocation7 + $0x2c] ss:$16 sps:$4 sm:$0xff]  }
  0x7d   :  { %463 = vmatprep.subr.bf16.mxu0 %v3541_v14  ;;  %v3567_v48 = vld [vmem:[#allocation4 + $0xc0] ss:$40 sps:$4 sm:$0xff]  }
  0x7e   :  { %v3590_v51 = vld [vmem:[#allocation7 + $0x64] ss:$16 sps:$4 sm:$0xff]   ;;  %v3588_v54 = vld [vmem:[#allocation7 + $0x60] ss:$16 sps:$4 sm:$0xff]   ;;  %v3579_v56 = vld [vmem:[#allocation7 + $0x28] ss:$16 sps:$4 sm:$0xff]  }
  0x7f   :  { %v3596_v55 = vld [vmem:[#allocation7 + $0x84] ss:$16 sps:$4 sm:$0xff]   ;;  %v3587_v57 = vld [vmem:[#allocation7 + $0x4c] ss:$16 sps:$4 sm:$0xff]   ;;  %v3594_v58 = vld [vmem:[#allocation7 + $0x80] ss:$16 sps:$4 sm:$0xff]  }
  0x80   :  { %464 = vmatpush1.bf16.msra.mxu0 %v3539_v15  ;;  %v3602_v59 = vld [vmem:[#allocation7 + $0xa4] ss:$16 sps:$4 sm:$0xff]   ;;  %v3585_v60 = vld [vmem:[#allocation7 + $0x48] ss:$16 sps:$4 sm:$0xff]   ;;  %v3593_v61 = vld [vmem:[#allocation7 + $0x6c] ss:$16 sps:$4 sm:$0xff]  }
  0x81   :  { %541 = vmatprep.subr.bf16.mxu0 %v3548_v18  ;;  %v3600_v62 = vld [vmem:[#allocation7 + $0xa0] ss:$16 sps:$4 sm:$0xff]   ;;  %v3608_v63 = vld [vmem:[#allocation7 + $0xc4] ss:$16 sps:$4 sm:$0xff]   ;;  %v3591_v0 = vld [vmem:[#allocation7 + $0x68] ss:$16 sps:$4 sm:$0xff]  }
  0x82   :  { %v3599_v1 = vld [vmem:[#allocation7 + $0x8c] ss:$16 sps:$4 sm:$0xff]   ;;  %v3606_v2 = vld [vmem:[#allocation7 + $0xc0] ss:$16 sps:$4 sm:$0xff]   ;;  %v3614_v3 = vld [vmem:[#allocation7 + $0xe4] ss:$16 sps:$4 sm:$0xff]  }
  0x83   :  { %v3597_v4 = vld [vmem:[#allocation7 + $0x88] ss:$16 sps:$4 sm:$0xff]   ;;  %v3605_v5 = vld [vmem:[#allocation7 + $0xac] ss:$16 sps:$4 sm:$0xff]   ;;  %v3612_v6 = vld [vmem:[#allocation7 + $0xe0] ss:$16 sps:$4 sm:$0xff]  }
  0x84   :  { %v3620_v7 = vld [vmem:[#allocation7 + $0x104] ss:$16 sps:$4 sm:$0xff]   ;;  %v3603_v8 = vld [vmem:[#allocation7 + $0xa8] ss:$16 sps:$4 sm:$0xff]   ;;  %v3611_v9 = vld [vmem:[#allocation7 + $0xcc] ss:$16 sps:$4 sm:$0xff]  }
  0x85   :  { %v3618_v10 = vld [vmem:[#allocation7 + $0x100] ss:$16 sps:$4 sm:$0xff]   ;;  %v3626_v11 = vld [vmem:[#allocation7 + $0x124] ss:$16 sps:$4 sm:$0xff]   ;;  %v3609_v12 = vld [vmem:[#allocation7 + $0xc8] ss:$16 sps:$4 sm:$0xff]  }
  0x86   :  { %v3617_v13 = vld [vmem:[#allocation7 + $0xec] ss:$16 sps:$4 sm:$0xff]   ;;  %v3624_v14 = vld [vmem:[#allocation7 + $0x120] ss:$16 sps:$4 sm:$0xff]   ;;  %v3632_v15 = vld [vmem:[#allocation7 + $0x144] ss:$16 sps:$4 sm:$0xff]  }
  0x87   :  { %v3615_v16 = vld [vmem:[#allocation7 + $0xe8] ss:$16 sps:$4 sm:$0xff]   ;;  %v3623_v17 = vld [vmem:[#allocation7 + $0x10c] ss:$16 sps:$4 sm:$0xff]   ;;  %v3630_v18 = vld [vmem:[#allocation7 + $0x140] ss:$16 sps:$4 sm:$0xff]  }
 0x14a   :  { %v172_v21 = vpop.f32.mrb[0].mxu0 }
 0x14b   :  { %v173_v22 = vadd.f32 %v3089_v20, %v172_v21  ;;  %v3457_v23 = vpop.f32.mrb[1].mxu0  ;;  %v3621_v20 = vld [vmem:[#allocation7 + $0x108] ss:$16 sps:$4 sm:$0xff]   ;;  %v3629_v21 = vld [vmem:[#allocation7 + $0x12c] ss:$16 sps:$4 sm:$0xff]  }
 0x14c   :  { %v175_v24 = vpop.f32.mrb[2].mxu0  ;;  %v3644_v23 = vld [vmem:[#allocation7 + $0x184] ss:$16 sps:$4 sm:$0xff]  }
 0x14d   :  { %v178_v25 = vmax.f32 %v173_v22, 0.0  ;;  %v3458_v26 = vpop.f32.mrb[3].mxu0  ;;  %v3636_v22 = vld [vmem:[#allocation7 + $0x160] ss:$16 sps:$4 sm:$0xff]   ;;  %v3627_v24 = vld [vmem:[#allocation7 + $0x128] ss:$16 sps:$4 sm:$0xff]  }
 0x14e   :  { %v3642_v26 = vld [vmem:[#allocation7 + $0x180] ss:$16 sps:$4 sm:$0xff]  }
 0x14f   :  { %v179_v29 = vpack.c.bf16 %v178_v25, %v178_v25  ;;  %v3635_v25 = vld [vmem:[#allocation7 + $0x14c] ss:$16 sps:$4 sm:$0xff]  }
 0x151   :  { %3123 = vmatmul.mubr.msk.bf16.vlgmr.msra.gmra.mrb[0].mxu1 %vm414_vm2, %v179_v29  ;;  %3124 = vmatmul.mubr.msk.bf16.vlgmr.msra.gmra.mrb[4].mxu0 %vm414_vm2, %v179_v29 }
 0x152   :  { %501 = vmatpush1.bf16.msra.mxu1 %v3543_v27  ;;  %542 = vmatpush1.bf16.msra.mxu0 %v3546_v28  ;;  %v3650_v27 = vld [vmem:[#allocation7 + $0x1a4] ss:$16 sps:$4 sm:$0xff]   ;;  %v3633_v28 = vld [vmem:[#allocation7 + $0x148] ss:$16 sps:$4 sm:$0xff]  }
 0x153   :  { %502 = vmatprep.subr.bf16.mxu1 %v3551_v30  ;;  %543 = vmatprep.subr.bf16.mxu0 %v3554_v31  ;;  %v3648_v30 = vld [vmem:[#allocation7 + $0x1a0] ss:$16 sps:$4 sm:$0xff]   ;;  %v3656_v31 = vld [vmem:[#allocation7 + $0x1c4] ss:$16 sps:$4 sm:$0xff]  }
 0x154   :  { %532 = vmatprep.mubr.bf16.mxu1 %v3820_v19  ;;  %573 = vmatprep.mubr.bf16.mxu0 %v3820_v19 }
 0x156   :  { %503 = vmatpush1.bf16.msra.mxu1 %v3549_v32  ;;  %544 = vmatpush1.bf16.msra.mxu0 %v3552_v33  ;;  %v3639_v32 = vld [vmem:[#allocation7 + $0x168] ss:$16 sps:$4 sm:$0xff]   ;;  %v3647_v33 = vld [vmem:[#allocation7 + $0x18c] ss:$16 sps:$4 sm:$0xff]  }
 0x157   :  { %504 = vmatprep.subr.bf16.mxu1 %v3557_v34  ;;  %545 = vmatprep.subr.bf16.mxu0 %v3560_v35  ;;  %v3654_v34 = vld [vmem:[#allocation7 + $0x1c0] ss:$16 sps:$4 sm:$0xff]   ;;  %v3645_v35 = vld [vmem:[#allocation7 + $0x188] ss:$16 sps:$4 sm:$0xff]  }
 0x15a   :  { %505 = vmatpush1.bf16.msra.mxu1 %v3555_v36  ;;  %546 = vmatpush1.bf16.msra.mxu0 %v3558_v37  ;;  %v3653_v36 = vld [vmem:[#allocation7 + $0x1ac] ss:$16 sps:$4 sm:$0xff]   ;;  %v3651_v37 = vld [vmem:[#allocation7 + $0x1a8] ss:$16 sps:$4 sm:$0xff]  }
 0x15b   :  { %582 = vmatprep.subr.bf16.mxu1 %v3563_v38  ;;  %1031 = vmatprep.subr.bf16.mxu0 %v3572_v39  ;;  %v3659_v38 = vld [vmem:[#allocation7 + $0x1cc] ss:$16 sps:$4 sm:$0xff]   ;;  %v3657_v39 = vld [vmem:[#allocation7 + $0x1c8] ss:$16 sps:$4 sm:$0xff]  }
 0x15d   :  { %3125 = vmatmul.mubr.msk.bf16.vlgmr.msra.gmra.mrb[4].mxu1 %vm414_vm2, %v179_v29  ;;  %3126 = vmatmul.mubr.msk.bf16.vlgmr.msra.gmra.mrb[8].mxu0 %vm414_vm2, %v179_v29 }
 0x15e   :  { %583 = vmatpush1.bf16.msra.mxu1 %v3561_v40  ;;  %614 = vmatprep.mubr.bf16.mxu1 %v3820_v19  ;;  %v3638_v19 = vld [vmem:[#allocation7 + $0x164] ss:$16 sps:$4 sm:$0xff]  }
 0x15f   :  { %584 = vmatprep.subr.bf16.mxu1 %v3566_v41  ;;  %1032 = vmatpush1.bf16.msra.mxu0 %v3570_v42  ;;  %v3662_v40 = vld [vmem:[#allocation7 + $0x1e4] ss:$16 sps:$4 sm:$0xff]   ;;  %v3665_v41 = vld [vmem:[#allocation7 + $0x1ec] ss:$16 sps:$4 sm:$0xff]   ;;  %v3660_v42 = vld [vmem:[#allocation7 + $0x1e0] ss:$16 sps:$4 sm:$0xff]  }
 0x160   :  { %1033 = vmatprep.subr.bf16.mxu0 %v3578_v43  ;;  %v3663_v43 = vld [vmem:[#allocation7 + $0x1e8] ss:$16 sps:$4 sm:$0xff]  }
 0x162   :  { %585 = vmatpush1.bf16.msra.mxu1 %v3564_v44  ;;  %v1121_v44 = vld [vmem:[#allocation9] sm:$0xff] }
 0x163   :  { %586 = vmatprep.subr.bf16.mxu1 %v3569_v45  ;;  %1034 = vmatpush1.bf16.msra.mxu0 %v3576_v46  ;;  %v1125_v45 = vld [vmem:[#allocation9 + $0x20] sm:$0xff]  ;;  %v1122_v46 = vld [vmem:[#allocation9 + $0x8] sm:$0xff] }
 0x164   :  { %1035 = vmatprep.subr.bf16.mxu0 %v3584_v47  ;;  %v3192_v47 = vcombine.low %v1121_v44, %v1125_v45 }
 0x166   :  { %587 = vmatpush1.bf16.msra.mxu1 %v3567_v48  ;;  %v3193_v48 = vcombine.high %v1121_v44, %v1125_v45  ;;  %v1174_v44 = vld [vmem:[#allocation9 + $0x1a8] sm:$0xff] }
 0x167   :  { %1072 = vmatprep.subr.bf16.mxu1 %v3575_v49  ;;  %1036 = vmatpush1.bf16.msra.mxu0 %v3582_v50  ;;  %v1126_v49 = vld [vmem:[#allocation9 + $0x28] sm:$0xff] }
 0x168   :  { %1037 = vmatprep.subr.bf16.mxu0 %v3590_v51  ;;  %v3194_v50 = vcombine.low %v1122_v46, %v1126_v49  ;;  %v3195_v51 = vcombine.high %v1122_v46, %v1126_v49  ;;  %v1177_v49 = vld [vmem:[#allocation9 + $0x1c0] sm:$0xff] }
 0x169   :  { %3127 = vmatmul.mubr.msk.bf16.vlgmr.msra.gmra.mrb[8].mxu1 %vm414_vm2, %v179_v29  ;;  %v3641_v29 = vld [vmem:[#allocation7 + $0x16c] ss:$16 sps:$4 sm:$0xff]  }
 0x16a   :  { %1073 = vmatpush1.bf16.msra.mxu1 %v3573_v52  ;;  %v214_v52 = vlaneseq }
 0x16b   :  { %1074 = vmatprep.subr.bf16.mxu1 %v3581_v53  ;;  %1038 = vmatpush1.bf16.msra.mxu0 %v3588_v54 }
 0x16c   :  { %1039 = vmatprep.subr.bf16.mxu0 %v3596_v55  ;;  %v3958_v53 = vshrl.u32 %v214_v52, 7  ;;  %v211_v55 = vld [vmem:[#allocation6 + $0x8] sm:$0x3]  ;;  %v1182_v52 = vld [vmem:[#allocation9 + $0x1e8] sm:$0xff] }
 0x16e   :  { %1075 = vmatpush1.bf16.msra.mxu1 %v3579_v56  ;;  %v3961_v54 = vsub.s32 0, %v3958_v53  ;;  %v3964_v56 = vsub.s32 1, %v3958_v53 }
 0x16f   :  { %1076 = vmatprep.subr.bf16.mxu1 %v3587_v57  ;;  %1040 = vmatpush1.bf16.msra.mxu0 %v3594_v58 }
 0x170   :  { %1041 = vmatprep.subr.bf16.mxu0 %v3602_v59  ;;  %v249_v57 = vrot.slane %v211_v55, %v3961_v54  ;;  %v253_v58 = vrot.slane %v211_v55, %v3964_v56 }
 0x172   :  { %1077 = vmatpush1.bf16.msra.mxu1 %v3585_v60 }
 0x173   :  { %1078 = vmatprep.subr.bf16.mxu1 %v3593_v61  ;;  %1042 = vmatpush1.bf16.msra.mxu0 %v3600_v62  ;;  %v1129_v62 = vld [vmem:[#allocation9 + $0x40] sm:$0xff] }
 0x174   :  { %1043 = vmatprep.subr.bf16.mxu0 %v3608_v63 }
 0x176   :  { %1079 = vmatpush1.bf16.msra.mxu1 %v3591_v0 }
 0x177   :  { %1080 = vmatprep.subr.bf16.mxu1 %v3599_v1  ;;  %1044 = vmatpush1.bf16.msra.mxu0 %v3606_v2  ;;  %v1133_v1 = vld [vmem:[#allocation9 + $0x60] sm:$0xff]  ;;  %v1130_v2 = vld [vmem:[#allocation9 + $0x48] sm:$0xff] }
 0x178   :  { %1045 = vmatprep.subr.bf16.mxu0 %v3614_v3  ;;  %v1134_v3 = vld [vmem:[#allocation9 + $0x68] sm:$0xff] }
 0x17a   :  { %1081 = vmatpush1.bf16.msra.mxu1 %v3597_v4 }
 0x17b   :  { %1082 = vmatprep.subr.bf16.mxu1 %v3605_v5  ;;  %1046 = vmatpush1.bf16.msra.mxu0 %v3612_v6 }
 0x17c   :  { %1047 = vmatprep.subr.bf16.mxu0 %v3620_v7  ;;  %v3201_v7 = vcombine.high %v1129_v62, %v1133_v1 }
 0x17e   :  { %1083 = vmatpush1.bf16.msra.mxu1 %v3603_v8  ;;  %v3203_v8 = vcombine.high %v1130_v2, %v1134_v3 }
 0x17f   :  { %1084 = vmatprep.subr.bf16.mxu1 %v3611_v9  ;;  %1048 = vmatpush1.bf16.msra.mxu0 %v3618_v10  ;;  %v1137_v9 = vld [vmem:[#allocation9 + $0x80] sm:$0xff] }
 0x180   :  { %1049 = vmatprep.subr.bf16.mxu0 %v3626_v11  ;;  %v1141_v10 = vld [vmem:[#allocation9 + $0xa0] sm:$0xff]  ;;  %v1138_v11 = vld [vmem:[#allocation9 + $0x88] sm:$0xff] }
 0x182   :  { %1085 = vmatpush1.bf16.msra.mxu1 %v3609_v12  ;;  %v1142_v12 = vld [vmem:[#allocation9 + $0xa8] sm:$0xff] }
 0x183   :  { %1086 = vmatprep.subr.bf16.mxu1 %v3617_v13  ;;  %1050 = vmatpush1.bf16.msra.mxu0 %v3624_v14  ;;  %v3200_v13 = vcombine.low %v1129_v62, %v1133_v1  ;;  %v3202_v14 = vcombine.low %v1130_v2, %v1134_v3  ;;  %v1186_v62 = vld [vmem:[#allocation9 + $0x208] sm:$0xff] }
 0x184   :  { %1051 = vmatprep.subr.bf16.mxu0 %v3632_v15  ;;  %v3209_v15 = vcombine.high %v1137_v9, %v1141_v10 }
 0x186   :  { %1087 = vmatpush1.bf16.msra.mxu1 %v3615_v16  ;;  %v3211_v16 = vcombine.high %v1138_v11, %v1142_v12 }
 0x187   :  { %1088 = vmatprep.subr.bf16.mxu1 %v3623_v17  ;;  %1052 = vmatpush1.bf16.msra.mxu0 %v3630_v18  ;;  %v1145_v17 = vld [vmem:[#allocation9 + $0xc0] sm:$0xff] }
 0x188   :  { %1053 = vmatprep.subr.bf16.mxu0 %v3638_v19  ;;  %v1149_v18 = vld [vmem:[#allocation9 + $0xe0] sm:$0xff]  ;;  %v1146_v19 = vld [vmem:[#allocation9 + $0xc8] sm:$0xff] }
 0x18a   :  { %1089 = vmatpush1.bf16.msra.mxu1 %v3621_v20  ;;  %v1150_v20 = vld [vmem:[#allocation9 + $0xe8] sm:$0xff] }
 0x18b   :  { %1090 = vmatprep.subr.bf16.mxu1 %v3629_v21  ;;  %1054 = vmatpush1.bf16.msra.mxu0 %v3636_v22  ;;  %v3208_v21 = vcombine.low %v1137_v9, %v1141_v10  ;;  %v3210_v22 = vcombine.low %v1138_v11, %v1142_v12  ;;  %v1201_v12 = vld [vmem:[#allocation9 + $0x280] sm:$0xff] }
 0x18c   :  { %1055 = vmatprep.subr.bf16.mxu0 %v3644_v23  ;;  %v3217_v23 = vcombine.high %v1145_v17, %v1149_v18 }
 0x18e   :  { %1091 = vmatpush1.bf16.msra.mxu1 %v3627_v24  ;;  %v3219_v24 = vcombine.high %v1146_v19, %v1150_v20 }
 0x18f   :  { %1092 = vmatprep.subr.bf16.mxu1 %v3635_v25  ;;  %1056 = vmatpush1.bf16.msra.mxu0 %v3642_v26  ;;  %v1153_v25 = vld [vmem:[#allocation9 + $0x100] sm:$0xff] }
 0x190   :  { %1057 = vmatprep.subr.bf16.mxu0 %v3650_v27  ;;  %v1157_v26 = vld [vmem:[#allocation9 + $0x120] sm:$0xff]  ;;  %v1154_v27 = vld [vmem:[#allocation9 + $0x108] sm:$0xff] }
 0x192   :  { %1093 = vmatpush1.bf16.msra.mxu1 %v3633_v28  ;;  %v1158_v28 = vld [vmem:[#allocation9 + $0x128] sm:$0xff] }
 0x193   :  { %1094 = vmatprep.subr.bf16.mxu1 %v3641_v29  ;;  %1058 = vmatpush1.bf16.msra.mxu0 %v3648_v30  ;;  %v3216_v29 = vcombine.low %v1145_v17, %v1149_v18  ;;  %v3218_v30 = vcombine.low %v1146_v19, %v1150_v20  ;;  %v1209_v20 = vld [vmem:[#allocation9 + $0x2c0] sm:$0xff] }
 0x194   :  { %1059 = vmatprep.subr.bf16.mxu0 %v3656_v31  ;;  %v3225_v31 = vcombine.high %v1153_v25, %v1157_v26 }
 0x196   :  { %1095 = vmatpush1.bf16.msra.mxu1 %v3639_v32  ;;  %v3227_v32 = vcombine.high %v1154_v27, %v1158_v28 }
 0x197   :  { %1096 = vmatprep.subr.bf16.mxu1 %v3647_v33  ;;  %1060 = vmatpush1.bf16.msra.mxu0 %v3654_v34  ;;  %v1161_v33 = vld [vmem:[#allocation9 + $0x140] sm:$0xff] }
 0x198   :  { %1061 = vmatprep.subr.bf16.mxu0 %v3662_v40  ;;  %v1165_v34 = vld [vmem:[#allocation9 + $0x160] sm:$0xff] }
 0x199   :  { %v3232_v45 = vcombine.low %v1161_v33, %v1165_v34 }
 0x19a   :  { %1097 = vmatpush1.bf16.msra.mxu1 %v3645_v35  ;;  %v1162_v35 = vld [vmem:[#allocation9 + $0x148] sm:$0xff] }
 0x19b   :  { %1098 = vmatprep.subr.bf16.mxu1 %v3653_v36  ;;  %1062 = vmatpush1.bf16.msra.mxu0 %v3660_v42  ;;  %v1166_v36 = vld [vmem:[#allocation9 + $0x168] sm:$0xff]  ;;  %v1173_v42 = vld [vmem:[#allocation9 + $0x1a0] sm:$0xff] }
 0x19c   :  { %2781 = vmatprep.subr.bf16.mxu0 %v3195_v51  ;;  %v3235_v40 = vcombine.high %v1162_v35, %v1166_v36  ;;  %v3234_v46 = vcombine.low %v1162_v35, %v1166_v36  ;;  %v1178_v51 = vld [vmem:[#allocation9 + $0x1c8] sm:$0xff]  ;;  %v1225_v36 = vld [vmem:[#allocation9 + $0x340] sm:$0xff] }
 0x19d   :  { %v3250_v1 = vcombine.low %v1178_v51, %v1182_v52 }
 0x19e   :  { %1099 = vmatpush1.bf16.msra.mxu1 %v3651_v37  ;;  %v3224_v37 = vcombine.low %v1153_v25, %v1157_v26 }
 0x19f   :  { %1100 = vmatprep.subr.bf16.mxu1 %v3659_v38  ;;  %v3226_v38 = vcombine.low %v1154_v27, %v1158_v28  ;;  %v1217_v28 = vld [vmem:[#allocation9 + $0x300] sm:$0xff] }
 0x1a2   :  { %1101 = vmatpush1.bf16.msra.mxu1 %v3657_v39  ;;  %v3233_v39 = vcombine.high %v1161_v33, %v1165_v34 }
 0x1a3   :  { %1102 = vmatprep.subr.bf16.mxu1 %v3665_v41  ;;  %v1169_v41 = vld [vmem:[#allocation9 + $0x180] sm:$0xff] }
 0x1a4   :  { %v3240_v55 = vcombine.low %v1169_v41, %v1173_v42 }
 0x1a6   :  { %1103 = vmatpush1.bf16.msra.mxu1 %v3663_v43  ;;  %v1170_v43 = vld [vmem:[#allocation9 + $0x188] sm:$0xff] }
 0x1a7   :  { %2699 = vmatprep.subr.bf16.mxu1 %v3193_v48  ;;  %v3243_v48 = vcombine.high %v1170_v43, %v1174_v44 }
 0x23c   :  { %v616_v59 = vpop.f32.mrb[8].mxu1 }
 0x23d   :  { %v617_v60 = vadd.f32 %v616_v59, %v249_v57  ;;  %v618_v61 = vpop.f32.mrb[9].mxu1  ;;  %v3242_v57 = vcombine.low %v1170_v43, %v1174_v44  ;;  %v3251_v59 = vcombine.high %v1178_v51, %v1182_v52 }
 0x23e   :  { %v619_v63 = vadd.f32 %v618_v61, %v253_v58  ;;  %v620_v0 = vpop.f32.mrb[10].mxu1  ;;  %v1189_v61 = vld [vmem:[#allocation9 + $0x220] sm:$0xff] }
 0x23f   :  { %v621_v4 = vpop.f32.mrb[11].mxu1  ;;  %v623_v6 = vpack.c.bf16 %v617_v60, %v617_v60  ;;  %v1185_v60 = vld [vmem:[#allocation9 + $0x200] sm:$0xff] }
 0x240   :  { %v624_v5 = vpack.c.bf16 %v619_v63, %v619_v63  ;;  %v1190_v63 = vld [vmem:[#allocation9 + $0x228] sm:$0xff]  ;;  %v3257_v2 = vcombine.high %v1185_v60, %v1189_v61  ;;  %v1193_v4 = vld [vmem:[#allocation9 + $0x240] sm:$0xff] }
 0x241   :  { %v3259_v3 = vcombine.high %v1186_v62, %v1190_v63  ;;  %v3258_v9 = vcombine.low %v1186_v62, %v1190_v63 }
 0x242   :  { %1063 = vmatprep.mubr.bf16.mxu0 %v624_v5  ;;  %1104 = vmatprep.mubr.bf16.mxu1 %v624_v5  ;;  %v1197_v5 = vld [vmem:[#allocation9 + $0x260] sm:$0xff] }
 0x243   :  { %1064 = vmatmul.mubr.bf16.vlgmr.msra.gmra.mrb[12].mxu0 %v623_v6  ;;  %1105 = vmatmul.mubr.bf16.vlgmr.msra.gmra.mrb[12].mxu1 %v623_v6  ;;  %v1194_v6 = vld [vmem:[#allocation9 + $0x248] sm:$0xff]  ;;  %v3265_v10 = vcombine.high %v1193_v4, %v1197_v5 }
 0x244   :  { %2700 = vmatpush1.bf16.msra.mxu1 %v3192_v47  ;;  %2782 = vmatpush1.bf16.msra.mxu0 %v3194_v50  ;;  %v3241_v47 = vcombine.high %v1169_v41, %v1173_v42  ;;  %v1181_v50 = vld [vmem:[#allocation9 + $0x1e0] sm:$0xff] }
 0x245   :  { %2701 = vmatprep.subr.bf16.mxu1 %v3201_v7  ;;  %2783 = vmatprep.subr.bf16.mxu0 %v3203_v8  ;;  %v3249_v58 = vcombine.high %v1177_v49, %v1181_v50  ;;  %v3248_v0 = vcombine.low %v1177_v49, %v1181_v50  ;;  %v1198_v7 = vld [vmem:[#allocation9 + $0x268] sm:$0xff]  ;;  %v3256_v8 = vcombine.low %v1185_v60, %v1189_v61 }
 0x246   :  { %v3267_v11 = vcombine.high %v1194_v6, %v1198_v7  ;;  %v3266_v17 = vcombine.low %v1194_v6, %v1198_v7  ;;  %v1238_v50 = vld [vmem:[#allocation9 + $0x3a8] sm:$0xff] }
 0x247   :  { %v1246_v61 = vld [vmem:[#allocation9 + $0x3e8] sm:$0xff] }
 0x248   :  { %2702 = vmatpush1.bf16.msra.mxu1 %v3200_v13  ;;  %2784 = vmatpush1.bf16.msra.mxu0 %v3202_v14  ;;  %v1205_v13 = vld [vmem:[#allocation9 + $0x2a0] sm:$0xff]  ;;  %v1202_v14 = vld [vmem:[#allocation9 + $0x288] sm:$0xff] }
 0x249   :  { %2703 = vmatprep.subr.bf16.mxu1 %v3209_v15  ;;  %2785 = vmatprep.subr.bf16.mxu0 %v3211_v16  ;;  %v1206_v15 = vld [vmem:[#allocation9 + $0x2a8] sm:$0xff]  ;;  %v3264_v16 = vcombine.low %v1193_v4, %v1197_v5  ;;  %v3273_v18 = vcombine.high %v1201_v12, %v1205_v13 }
 0x24a   :  { %v3275_v19 = vcombine.high %v1202_v14, %v1206_v15  ;;  %v3274_v25 = vcombine.low %v1202_v14, %v1206_v15  ;;  %v1254_v5 = vld [vmem:[#allocation9 + $0x428] sm:$0xff] }
 0x24c   :  { %2704 = vmatpush1.bf16.msra.mxu1 %v3208_v21  ;;  %2786 = vmatpush1.bf16.msra.mxu0 %v3210_v22  ;;  %v1213_v21 = vld [vmem:[#allocation9 + $0x2e0] sm:$0xff]  ;;  %v1210_v22 = vld [vmem:[#allocation9 + $0x2c8] sm:$0xff] }
 0x24d   :  { %2705 = vmatprep.subr.bf16.mxu1 %v3217_v23  ;;  %2787 = vmatprep.subr.bf16.mxu0 %v3219_v24  ;;  %v1214_v23 = vld [vmem:[#allocation9 + $0x2e8] sm:$0xff]  ;;  %v3272_v24 = vcombine.low %v1201_v12, %v1205_v13  ;;  %v3281_v26 = vcombine.high %v1209_v20, %v1213_v21 }
 0x24e   :  { %v3283_v27 = vcombine.high %v1210_v22, %v1214_v23  ;;  %v3282_v33 = vcombine.low %v1210_v22, %v1214_v23 }
 0x250   :  { %2706 = vmatpush1.bf16.msra.mxu1 %v3216_v29  ;;  %2788 = vmatpush1.bf16.msra.mxu0 %v3218_v30  ;;  %v1221_v29 = vld [vmem:[#allocation9 + $0x320] sm:$0xff]  ;;  %v1218_v30 = vld [vmem:[#allocation9 + $0x308] sm:$0xff] }
 0x251   :  { %2707 = vmatprep.subr.bf16.mxu1 %v3225_v31  ;;  %2789 = vmatprep.subr.bf16.mxu0 %v3227_v32  ;;  %v1222_v31 = vld [vmem:[#allocation9 + $0x328] sm:$0xff]  ;;  %v3280_v32 = vcombine.low %v1209_v20, %v1213_v21  ;;  %v3289_v34 = vcombine.high %v1217_v28, %v1221_v29 }
 0x252   :  { %v3291_v35 = vcombine.high %v1218_v30, %v1222_v31  ;;  %v3290_v41 = vcombine.low %v1218_v30, %v1222_v31  ;;  %v1258_v30 = vld [vmem:[#allocation9 + $0x448] sm:$0xff] }
 0x253   :  { %v1262_v31 = vld [vmem:[#allocation9 + $0x468] sm:$0xff] }
 0x254   :  { %2708 = vmatpush1.bf16.msra.mxu1 %v3224_v37  ;;  %2790 = vmatpush1.bf16.msra.mxu0 %v3226_v38  ;;  %v1229_v37 = vld [vmem:[#allocation9 + $0x360] sm:$0xff]  ;;  %v1226_v38 = vld [vmem:[#allocation9 + $0x348] sm:$0xff] }
 0x255   :  { %2709 = vmatprep.subr.bf16.mxu1 %v3233_v39  ;;  %2791 = vmatprep.subr.bf16.mxu0 %v3235_v40  ;;  %v1230_v39 = vld [vmem:[#allocation9 + $0x368] sm:$0xff]  ;;  %v3288_v40 = vcombine.low %v1217_v28, %v1221_v29  ;;  %v3297_v42 = vcombine.high %v1225_v36, %v1229_v37  ;;  %v3296_v44 = vcombine.low %v1225_v36, %v1229_v37  ;;  %v1261_v29 = vld [vmem:[#allocation9 + $0x460] sm:$0xff] }
 0x256   :  { %v3299_v43 = vcombine.high %v1226_v38, %v1230_v39  ;;  %v3331_v36 = vcombine.high %v1258_v30, %v1262_v31  ;;  %v1269_v37 = vld [vmem:[#allocation9 + $0x4a0] sm:$0xff] }
 0x258   :  { %2710 = vmatpush1.bf16.msra.mxu1 %v3232_v45  ;;  %2792 = vmatpush1.bf16.msra.mxu0 %v3234_v46  ;;  %v3298_v45 = vcombine.low %v1226_v38, %v1230_v39  ;;  %v1233_v46 = vld [vmem:[#allocation9 + $0x380] sm:$0xff]  ;;  %v1266_v38 = vld [vmem:[#allocation9 + $0x488] sm:$0xff] }
 0x259   :  { %2711 = vmatprep.subr.bf16.mxu1 %v3241_v47  ;;  %2793 = vmatprep.subr.bf16.mxu0 %v3243_v48  ;;  %v1237_v47 = vld [vmem:[#allocation9 + $0x3a0] sm:$0xff]  ;;  %v1234_v48 = vld [vmem:[#allocation9 + $0x388] sm:$0xff] }
 0x25a   :  { %v3305_v49 = vcombine.high %v1233_v46, %v1237_v47  ;;  %v3304_v51 = vcombine.low %v1233_v46, %v1237_v47  ;;  %v3306_v52 = vcombine.low %v1234_v48, %v1238_v50  ;;  %v1270_v39 = vld [vmem:[#allocation9 + $0x4a8] sm:$0xff]  ;;  %v1277_v46 = vld [vmem:[#allocation9 + $0x4e0] sm:$0xff] }
 0x25b   :  { %v1274_v47 = vld [vmem:[#allocation9 + $0x4c8] sm:$0xff] }
 0x25c   :  { %2712 = vmatpush1.bf16.msra.mxu1 %v3240_v55  ;;  %2794 = vmatpush1.bf16.msra.mxu0 %v3242_v57  ;;  %v3307_v55 = vcombine.high %v1234_v48, %v1238_v50  ;;  %v1241_v57 = vld [vmem:[#allocation9 + $0x3c0] sm:$0xff]  ;;  %v1278_v48 = vld [vmem:[#allocation9 + $0x4e8] sm:$0xff]  ;;  %v3338_v50 = vcombine.low %v1266_v38, %v1270_v39 }
 0x25d   :  { %2713 = vmatprep.subr.bf16.mxu1 %v3249_v58  ;;  %2795 = vmatprep.subr.bf16.mxu0 %v3251_v59  ;;  %v1245_v58 = vld [vmem:[#allocation9 + $0x3e0] sm:$0xff]  ;;  %v1242_v59 = vld [vmem:[#allocation9 + $0x3c8] sm:$0xff] }
 0x25e   :  { %v3313_v60 = vcombine.high %v1241_v57, %v1245_v58  ;;  %v3312_v62 = vcombine.low %v1241_v57, %v1245_v58  ;;  %v3314_v63 = vcombine.low %v1242_v59, %v1246_v61  ;;  %v1285_v57 = vld [vmem:[#allocation9 + $0x520] sm:$0xff]  ;;  %v1282_v58 = vld [vmem:[#allocation9 + $0x508] sm:$0xff] }
 0x260   :  { %2714 = vmatpush1.bf16.msra.mxu1 %v3248_v0  ;;  %2796 = vmatpush1.bf16.msra.mxu0 %v3250_v1  ;;  %v3315_v0 = vcombine.high %v1242_v59, %v1246_v61  ;;  %v1249_v1 = vld [vmem:[#allocation9 + $0x400] sm:$0xff]  ;;  %v1286_v59 = vld [vmem:[#allocation9 + $0x528] sm:$0xff]  ;;  %v3346_v61 = vcombine.low %v1274_v47, %v1278_v48 }
 0x261   :  { %2715 = vmatprep.subr.bf16.mxu1 %v3257_v2  ;;  %2797 = vmatprep.subr.bf16.mxu0 %v3259_v3  ;;  %v1253_v2 = vld [vmem:[#allocation9 + $0x420] sm:$0xff]  ;;  %v1250_v3 = vld [vmem:[#allocation9 + $0x408] sm:$0xff] }
 0x262   :  { %v3321_v4 = vcombine.high %v1249_v1, %v1253_v2  ;;  %v3320_v6 = vcombine.low %v1249_v1, %v1253_v2  ;;  %v3322_v7 = vcombine.low %v1250_v3, %v1254_v5  ;;  %v1293_v1 = vld [vmem:[#allocation9 + $0x560] sm:$0xff]  ;;  %v1290_v2 = vld [vmem:[#allocation9 + $0x548] sm:$0xff] }
 0x264   :  { %2716 = vmatpush1.bf16.msra.mxu1 %v3256_v8  ;;  %2798 = vmatpush1.bf16.msra.mxu0 %v3258_v9  ;;  %v3323_v8 = vcombine.high %v1250_v3, %v1254_v5  ;;  %v3971_v9 = vld [vmem:[%s4039_s6] sm:$0xf]  ;;  %v1294_v3 = vld [vmem:[#allocation9 + $0x568] sm:$0xff]  ;;  %v3354_v5 = vcombine.low %v1282_v58, %v1286_v59 }
 0x265   :  { %2717 = vmatprep.subr.bf16.mxu1 %v3265_v10  ;;  %2799 = vmatprep.subr.bf16.mxu0 %v3267_v11  ;;  %v3974_v10 = vsub.s32 3, %v3958_v53  ;;  %v694_v11 = vrot.slane %v3971_v9, %v3961_v54  ;;  %v698_v12 = vrot.slane %v3971_v9, %v3964_v56 }
 0x267   :  { %v706_v13 = vrot.slane %v3971_v9, %v3974_v10 }
 0x268   :  { %2718 = vmatpush1.bf16.msra.mxu1 %v3264_v16  ;;  %2800 = vmatpush1.bf16.msra.mxu0 %v3266_v17 }
 0x269   :  { %2719 = vmatprep.subr.bf16.mxu1 %v3273_v18  ;;  %2801 = vmatprep.subr.bf16.mxu0 %v3275_v19 }
 0x26c   :  { %2720 = vmatpush1.bf16.msra.mxu1 %v3272_v24  ;;  %2802 = vmatpush1.bf16.msra.mxu0 %v3274_v25 }
 0x26d   :  { %2721 = vmatprep.subr.bf16.mxu1 %v3281_v26  ;;  %2803 = vmatprep.subr.bf16.mxu0 %v3283_v27  ;;  %v1257_v27 = vld [vmem:[#allocation9 + $0x440] sm:$0xff] }
 0x270   :  { %2722 = vmatpush1.bf16.msra.mxu1 %v3280_v32  ;;  %2804 = vmatpush1.bf16.msra.mxu0 %v3282_v33 }
 0x271   :  { %2723 = vmatprep.subr.bf16.mxu1 %v3289_v34  ;;  %2805 = vmatprep.subr.bf16.mxu0 %v3291_v35  ;;  %v1265_v34 = vld [vmem:[#allocation9 + $0x480] sm:$0xff]  ;;  %v3329_v35 = vcombine.high %v1257_v27, %v1261_v29 }
 0x274   :  { %2724 = vmatpush1.bf16.msra.mxu1 %v3288_v40  ;;  %2806 = vmatpush1.bf16.msra.mxu0 %v3290_v41  ;;  %v3328_v41 = vcombine.low %v1257_v27, %v1261_v29  ;;  %v1313_v27 = vld [vmem:[#allocation9 + $0x600] sm:$0xff]  ;;  %v1314_v29 = vld [vmem:[#allocation9 + $0x608] sm:$0xff] }
 0x275   :  { %2725 = vmatprep.subr.bf16.mxu1 %v3297_v42  ;;  %2807 = vmatprep.subr.bf16.mxu0 %v3299_v43  ;;  %v3330_v42 = vcombine.low %v1258_v30, %v1262_v31  ;;  %v3337_v43 = vcombine.high %v1265_v34, %v1269_v37  ;;  %v1318_v30 = vld [vmem:[#allocation9 + $0x628] sm:$0xff] }
 0x278   :  { %2726 = vmatpush1.bf16.msra.mxu1 %v3296_v44  ;;  %2808 = vmatpush1.bf16.msra.mxu0 %v3298_v45  ;;  %v3339_v44 = vcombine.high %v1266_v38, %v1270_v39  ;;  %v1273_v45 = vld [vmem:[#allocation9 + $0x4c0] sm:$0xff]  ;;  %v1322_v39 = vld [vmem:[#allocation9 + $0x648] sm:$0xff] }
 0x279   :  { %2727 = vmatprep.subr.bf16.mxu1 %v3305_v49  ;;  %2809 = vmatprep.subr.bf16.mxu0 %v3307_v55  ;;  %v3336_v49 = vcombine.low %v1265_v34, %v1269_v37  ;;  %v1281_v55 = vld [vmem:[#allocation9 + $0x500] sm:$0xff] }
 0x27a   :  { %v1321_v37 = vld [vmem:[#allocation9 + $0x640] sm:$0xff] }
 0x27b   :  { %v1325_v38 = vld [vmem:[#allocation9 + $0x660] sm:$0xff] }
 0x27c   :  { %2728 = vmatpush1.bf16.msra.mxu1 %v3304_v51  ;;  %2810 = vmatpush1.bf16.msra.mxu0 %v3306_v52  ;;  %v3345_v51 = vcombine.high %v1273_v45, %v1277_v46  ;;  %v3347_v52 = vcombine.high %v1274_v47, %v1278_v48  ;;  %v1333_v47 = vld [vmem:[#allocation9 + $0x6a0] sm:$0xff]  ;;  %v1330_v48 = vld [vmem:[#allocation9 + $0x688] sm:$0xff] }
 0x27d   :  { %2729 = vmatprep.subr.bf16.mxu1 %v3313_v60  ;;  %2811 = vmatprep.subr.bf16.mxu0 %v3315_v0  ;;  %v3344_v60 = vcombine.low %v1273_v45, %v1277_v46  ;;  %v1289_v0 = vld [vmem:[#allocation9 + $0x540] sm:$0xff] }
 0x27e   :  { %v1329_v46 = vld [vmem:[#allocation9 + $0x680] sm:$0xff] }
 0x280   :  { %2730 = vmatpush1.bf16.msra.mxu1 %v3312_v62  ;;  %2812 = vmatpush1.bf16.msra.mxu0 %v3314_v63  ;;  %v3353_v62 = vcombine.high %v1281_v55, %v1285_v57  ;;  %v3355_v63 = vcombine.high %v1282_v58, %v1286_v59  ;;  %v1341_v58 = vld [vmem:[#allocation9 + $0x6e0] sm:$0xff]  ;;  %v1338_v59 = vld [vmem:[#allocation9 + $0x6c8] sm:$0xff] }
 0x281   :  { %2740 = vmatprep.subr.bf16.mxu1 %v3321_v4  ;;  %2822 = vmatprep.subr.bf16.mxu0 %v3323_v8  ;;  %v3352_v4 = vcombine.low %v1281_v55, %v1285_v57  ;;  %v1297_v8 = vld [vmem:[#allocation9 + $0x580] sm:$0xff] }
 0x282   :  { %v1337_v57 = vld [vmem:[#allocation9 + $0x6c0] sm:$0xff] }
 0x316   :  { %v1065_v14 = vpop.f32.mrb[12].mxu0  ;;  %v3982_v15 = vpop.f32.mrb[12].mxu1 }
 0x317   :  { %v1066_v16 = vadd.f32 %v1065_v14, %v694_v11  ;;  %v1067_v17 = vpop.f32.mrb[13].mxu0  ;;  %v1108_v18 = vpop.f32.mrb[13].mxu1  ;;  %v1301_v11 = vld [vmem:[#allocation9 + $0x5a0] sm:$0xff]  ;;  %v3360_v14 = vcombine.low %v1289_v0, %v1293_v1 }
 0x318   :  { %v1068_v19 = vadd.f32 %v1067_v17, %v698_v12  ;;  %v1109_v20 = vadd.f32 %v1108_v18, %v706_v13  ;;  %v1069_v21 = vpop.f32.mrb[14].mxu0  ;;  %v1110_v22 = vpop.f32.mrb[14].mxu1  ;;  %v1298_v12 = vld [vmem:[#allocation9 + $0x588] sm:$0xff]  ;;  %v3369_v17 = vcombine.high %v1297_v8, %v1301_v11 }
 0x319   :  { %v1113_v23 = vmax.f32 %v1066_v16, 0.0  ;;  %v1070_v24 = vpop.f32.mrb[15].mxu0  ;;  %v1111_v25 = vpop.f32.mrb[15].mxu1  ;;  %v1302_v13 = vld [vmem:[#allocation9 + $0x5a8] sm:$0xff]  ;;  %v3362_v16 = vcombine.low %v1290_v2, %v1294_v3 }
 0x31a   :  { %v1114_v26 = vmax.f32 %v1068_v19, 0.0  ;;  %v1116_v28 = vmax.f32 %v1109_v20, 0.0  ;;  %v3371_v18 = vcombine.high %v1298_v12, %v1302_v13  ;;  %v1305_v19 = vld [vmem:[#allocation9 + $0x5c0] sm:$0xff]  ;;  %v1306_v21 = vld [vmem:[#allocation9 + $0x5c8] sm:$0xff]  ;;  %v3370_v24 = vcombine.low %v1298_v12, %v1302_v13 }
 0x31b   :  { %v3986_v33 = vpack.c.bf16 %v1113_v23, %v1113_v23  ;;  %v1309_v20 = vld [vmem:[#allocation9 + $0x5e0] sm:$0xff]  ;;  %v1310_v22 = vld [vmem:[#allocation9 + $0x5e8] sm:$0xff]  ;;  %v3368_v23 = vcombine.low %v1297_v8, %v1301_v11 }
 0x31c   :  { %v3984_v32 = vpack.c.bf16 %v1114_v26, %v1114_v26  ;;  %v3990_v40 = vpack.c.bf16 %v1116_v28, %v1116_v28  ;;  %v3377_v25 = vcombine.high %v1305_v19, %v1309_v20  ;;  %v3379_v26 = vcombine.high %v1306_v21, %v1310_v22  ;;  %v1317_v28 = vld [vmem:[#allocation9 + $0x620] sm:$0xff]  ;;  %v1354_v13 = vld [vmem:[#allocation9 + $0x748] sm:$0xff] }
 0x31d   :  { %v3376_v31 = vcombine.low %v1305_v19, %v1309_v20  ;;  %v3378_v34 = vcombine.low %v1306_v21, %v1310_v22  ;;  %v1353_v11 = vld [vmem:[#allocation9 + $0x740] sm:$0xff] }
 0x31e   :  { %2731 = vmatprep.mubr.bf16.mxu1 %v3984_v32  ;;  %2813 = vmatprep.mubr.bf16.mxu0 %v3984_v32  ;;  %v1357_v12 = vld [vmem:[#allocation9 + $0x760] sm:$0xff] }
 0x31f   :  { %2732 = vmatmul.mubr.bf16.vlgmr.msra.gmra.mrb[0].mxu1 %v3986_v33  ;;  %2814 = vmatmul.mubr.bf16.vlgmr.msra.gmra.mrb[4].mxu0 %v3986_v33  ;;  %v3425_v19 = vcombine.high %v1353_v11, %v1357_v12  ;;  %v1361_v21 = vld [vmem:[#allocation9 + $0x780] sm:$0xff] }
 0x320   :  { %2741 = vmatpush1.bf16.msra.mxu1 %v3320_v6  ;;  %2823 = vmatpush1.bf16.msra.mxu0 %v3322_v7  ;;  %v3361_v6 = vcombine.high %v1289_v0, %v1293_v1  ;;  %v3363_v7 = vcombine.high %v1290_v2, %v1294_v3  ;;  %v1345_v1 = vld [vmem:[#allocation9 + $0x700] sm:$0xff]  ;;  %v1346_v3 = vld [vmem:[#allocation9 + $0x708] sm:$0xff] }
 0x321   :  { %2772 = vmatprep.mubr.bf16.mxu1 %v3990_v40  ;;  %2854 = vmatprep.mubr.bf16.mxu0 %v3990_v40  ;;  %v1349_v2 = vld [vmem:[#allocation9 + $0x720] sm:$0xff] }
 0x322   :  { %2742 = vmatprep.subr.bf16.mxu1 %v3329_v35  ;;  %2824 = vmatprep.subr.bf16.mxu0 %v3331_v36  ;;  %v3385_v35 = vcombine.high %v1313_v27, %v1317_v28  ;;  %v3387_v36 = vcombine.high %v1314_v29, %v1318_v30  ;;  %v1365_v22 = vld [vmem:[#allocation9 + $0x7a0] sm:$0xff] }
 0x324   :  { %2743 = vmatpush1.bf16.msra.mxu1 %v3328_v41  ;;  %2825 = vmatpush1.bf16.msra.mxu0 %v3330_v42  ;;  %v1326_v41 = vld [vmem:[#allocation9 + $0x668] sm:$0xff]  ;;  %v3384_v42 = vcombine.low %v1313_v27, %v1317_v28  ;;  %v3433_v28 = vcombine.high %v1361_v21, %v1365_v22 }
 0x325   :  { %2744 = vmatprep.subr.bf16.mxu1 %v3337_v43  ;;  %2826 = vmatprep.subr.bf16.mxu0 %v3339_v44  ;;  %v3386_v43 = vcombine.low %v1314_v29, %v1318_v30  ;;  %v3393_v44 = vcombine.high %v1321_v37, %v1325_v38  ;;  %v3395_v45 = vcombine.high %v1322_v39, %v1326_v41  ;;  %v1369_v30 = vld [vmem:[#allocation9 + $0x7c0] sm:$0xff] }
 0x328   :  { %2745 = vmatpush1.bf16.msra.mxu1 %v3336_v49  ;;  %2827 = vmatpush1.bf16.msra.mxu0 %v3338_v50  ;;  %v1334_v49 = vld [vmem:[#allocation9 + $0x6a8] sm:$0xff]  ;;  %v3392_v50 = vcombine.low %v1321_v37, %v1325_v38 }
 0x329   :  { %2746 = vmatprep.subr.bf16.mxu1 %v3345_v51  ;;  %2828 = vmatprep.subr.bf16.mxu0 %v3347_v52  ;;  %v3394_v51 = vcombine.low %v1322_v39, %v1326_v41  ;;  %v3401_v52 = vcombine.high %v1329_v46, %v1333_v47  ;;  %v3403_v55 = vcombine.high %v1330_v48, %v1334_v49 }
 0x32c   :  { %2747 = vmatpush1.bf16.msra.mxu1 %v3344_v60  ;;  %2829 = vmatpush1.bf16.msra.mxu0 %v3346_v61  ;;  %v1342_v60 = vld [vmem:[#allocation9 + $0x6e8] sm:$0xff]  ;;  %v3400_v61 = vcombine.low %v1329_v46, %v1333_v47 }
 0x32d   :  { %2748 = vmatprep.subr.bf16.mxu1 %v3353_v62  ;;  %2830 = vmatprep.subr.bf16.mxu0 %v3355_v63  ;;  %v3402_v62 = vcombine.low %v1330_v48, %v1334_v49  ;;  %v3409_v63 = vcombine.high %v1337_v57, %v1341_v58  ;;  %v3411_v0 = vcombine.high %v1338_v59, %v1342_v60 }
 0x330   :  { %2749 = vmatpush1.bf16.msra.mxu1 %v3352_v4  ;;  %2831 = vmatpush1.bf16.msra.mxu0 %v3354_v5  ;;  %v1350_v4 = vld [vmem:[#allocation9 + $0x728] sm:$0xff]  ;;  %v3408_v5 = vcombine.low %v1337_v57, %v1341_v58 }
 0x331   :  { %2750 = vmatprep.subr.bf16.mxu1 %v3361_v6  ;;  %2832 = vmatprep.subr.bf16.mxu0 %v3363_v7  ;;  %v3410_v6 = vcombine.low %v1338_v59, %v1342_v60  ;;  %v3417_v7 = vcombine.high %v1345_v1, %v1349_v2  ;;  %v3419_v8 = vcombine.high %v1346_v3, %v1350_v4 }
 0x334   :  { %2751 = vmatpush1.bf16.msra.mxu1 %v3360_v14  ;;  %2833 = vmatpush1.bf16.msra.mxu0 %v3362_v16  ;;  %v1358_v14 = vld [vmem:[#allocation9 + $0x768] sm:$0xff]  ;;  %v3416_v16 = vcombine.low %v1345_v1, %v1349_v2 }
 0x335   :  { %2752 = vmatprep.subr.bf16.mxu1 %v3369_v17  ;;  %2834 = vmatprep.subr.bf16.mxu0 %v3371_v18  ;;  %v3418_v17 = vcombine.low %v1346_v3, %v1350_v4  ;;  %v3997_v18 = vsub.s32 2, %v3958_v53  ;;  %v3427_v20 = vcombine.high %v1354_v13, %v1358_v14 }
 0x337   :  { %v702_v27 = vrot.slane %v3971_v9, %v3997_v18  ;;  %v1127_v9 = vld [vmem:[#allocation9 + $0x30] sm:$0xff] }
 0x338   :  { %2753 = vmatpush1.bf16.msra.mxu1 %v3368_v23  ;;  %2835 = vmatpush1.bf16.msra.mxu0 %v3370_v24  ;;  %v1362_v23 = vld [vmem:[#allocation9 + $0x788] sm:$0xff] }
 0x339   :  { %2754 = vmatprep.subr.bf16.mxu1 %v3377_v25  ;;  %2836 = vmatprep.subr.bf16.mxu0 %v3379_v26  ;;  %v1366_v24 = vld [vmem:[#allocation9 + $0x7a8] sm:$0xff]  ;;  %v3424_v25 = vcombine.low %v1353_v11, %v1357_v12  ;;  %v3426_v26 = vcombine.low %v1354_v13, %v1358_v14  ;;  %v1107_v38 = vadd.f32 %v3982_v15, %v702_v27  ;;  %v1132_v15 = vld [vmem:[#allocation9 + $0x58] sm:$0xff] }
 0x33a   :  { %v3435_v29 = vcombine.high %v1362_v23, %v1366_v24  ;;  %v3434_v37 = vcombine.low %v1362_v23, %v1366_v24  ;;  %v1163_v24 = vld [vmem:[#allocation9 + $0x150] sm:$0xff]  ;;  %v1168_v27 = vld [vmem:[#allocation9 + $0x178] sm:$0xff] }
 0x33b   :  { %v1115_v47 = vmax.f32 %v1107_v38, 0.0 }
 0x33c   :  { %2755 = vmatpush1.bf16.msra.mxu1 %v3376_v31  ;;  %2837 = vmatpush1.bf16.msra.mxu0 %v3378_v34  ;;  %v1373_v31 = vld [vmem:[#allocation9 + $0x7e0] sm:$0xff]  ;;  %v1370_v34 = vld [vmem:[#allocation9 + $0x7c8] sm:$0xff] }
 0x33d   :  { %2756 = vmatprep.subr.bf16.mxu1 %v3385_v35  ;;  %2838 = vmatprep.subr.bf16.mxu0 %v3387_v36  ;;  %v1374_v35 = vld [vmem:[#allocation9 + $0x7e8] sm:$0xff]  ;;  %v3432_v36 = vcombine.low %v1361_v21, %v1365_v22  ;;  %v3441_v39 = vcombine.high %v1369_v30, %v1373_v31  ;;  %v4002_v57 = vpack.c.bf16 %v1115_v47, %v1115_v47 }
 0x33e   :  { %v3443_v41 = vcombine.high %v1370_v34, %v1374_v35  ;;  %v3442_v46 = vcombine.low %v1370_v34, %v1374_v35  ;;  %v1171_v34 = vld [vmem:[#allocation9 + $0x190] sm:$0xff] }
 0x33f   :  { %v1175_v35 = vld [vmem:[#allocation9 + $0x1b0] sm:$0xff] }
 0x340   :  { %2757 = vmatpush1.bf16.msra.mxu1 %v3384_v42  ;;  %2839 = vmatpush1.bf16.msra.mxu0 %v3386_v43  ;;  %v1123_v42 = vld [vmem:[#allocation9 + $0x10] sm:$0xff]  ;;  %v1124_v43 = vld [vmem:[#allocation9 + $0x18] sm:$0xff] }
 0x341   :  { %2758 = vmatprep.subr.bf16.mxu1 %v3393_v44  ;;  %2840 = vmatprep.subr.bf16.mxu0 %v3395_v45  ;;  %v1128_v44 = vld [vmem:[#allocation9 + $0x38] sm:$0xff]  ;;  %v3440_v45 = vcombine.low %v1369_v30, %v1373_v31  ;;  %v3197_v48 = vcombine.high %v1123_v42, %v1127_v9 }
 0x342   :  { %v3199_v49 = vcombine.high %v1124_v43, %v1128_v44  ;;  %v3198_v58 = vcombine.low %v1124_v43, %v1128_v44  ;;  %v1183_v43 = vld [vmem:[#allocation9 + $0x1f0] sm:$0xff]  ;;  %v1180_v44 = vld [vmem:[#allocation9 + $0x1d8] sm:$0xff] }
 0x344   :  { %2759 = vmatpush1.bf16.msra.mxu1 %v3392_v50  ;;  %2841 = vmatpush1.bf16.msra.mxu0 %v3394_v51  ;;  %v1131_v50 = vld [vmem:[#allocation9 + $0x50] sm:$0xff] }
 0x345   :  { %2760 = vmatprep.subr.bf16.mxu1 %v3401_v52  ;;  %2842 = vmatprep.subr.bf16.mxu0 %v3403_v55  ;;  %v1135_v51 = vld [vmem:[#allocation9 + $0x70] sm:$0xff]  ;;  %v1136_v52 = vld [vmem:[#allocation9 + $0x78] sm:$0xff]  ;;  %v3196_v55 = vcombine.low %v1123_v42, %v1127_v9 }
 0x346   :  { %v3205_v59 = vcombine.high %v1131_v50, %v1135_v51  ;;  %v3207_v60 = vcombine.high %v1132_v15, %v1136_v52  ;;  %v3204_v1 = vcombine.low %v1131_v50, %v1135_v51  ;;  %v3206_v2 = vcombine.low %v1132_v15, %v1136_v52  ;;  %v1179_v9 = vld [vmem:[#allocation9 + $0x1d0] sm:$0xff]  ;;  %v1188_v15 = vld [vmem:[#allocation9 + $0x218] sm:$0xff] }
 0x347   :  { %v1187_v50 = vld [vmem:[#allocation9 + $0x210] sm:$0xff]  ;;  %v1192_v52 = vld [vmem:[#allocation9 + $0x238] sm:$0xff] }
 0x348   :  { %2761 = vmatpush1.bf16.msra.mxu1 %v3400_v61  ;;  %2843 = vmatpush1.bf16.msra.mxu0 %v3402_v62  ;;  %v1139_v61 = vld [vmem:[#allocation9 + $0x90] sm:$0xff] }
 0x349   :  { %2762 = vmatprep.subr.bf16.mxu1 %v3409_v63  ;;  %2844 = vmatprep.subr.bf16.mxu0 %v3411_v0  ;;  %v1143_v62 = vld [vmem:[#allocation9 + $0xb0] sm:$0xff]  ;;  %v1140_v63 = vld [vmem:[#allocation9 + $0x98] sm:$0xff] }
 0x34a   :  { %v1144_v0 = vld [vmem:[#allocation9 + $0xb8] sm:$0xff]  ;;  %v3213_v3 = vcombine.high %v1139_v61, %v1143_v62  ;;  %v3212_v11 = vcombine.low %v1139_v61, %v1143_v62  ;;  %v1191_v51 = vld [vmem:[#allocation9 + $0x230] sm:$0xff] }
 0x34b   :  { %v3215_v4 = vcombine.high %v1140_v63, %v1144_v0  ;;  %v3214_v12 = vcombine.low %v1140_v63, %v1144_v0  ;;  %v1195_v61 = vld [vmem:[#allocation9 + $0x250] sm:$0xff]  ;;  %v1196_v63 = vld [vmem:[#allocation9 + $0x258] sm:$0xff] }
 0x34c   :  { %2763 = vmatpush1.bf16.msra.mxu1 %v3408_v5  ;;  %2845 = vmatpush1.bf16.msra.mxu0 %v3410_v6  ;;  %v1147_v5 = vld [vmem:[#allocation9 + $0xd0] sm:$0xff]  ;;  %v1200_v0 = vld [vmem:[#allocation9 + $0x278] sm:$0xff] }
 0x34d   :  { %2764 = vmatprep.subr.bf16.mxu1 %v3417_v7  ;;  %2846 = vmatprep.subr.bf16.mxu0 %v3419_v8  ;;  %v1151_v6 = vld [vmem:[#allocation9 + $0xf0] sm:$0xff]  ;;  %v1148_v7 = vld [vmem:[#allocation9 + $0xd8] sm:$0xff] }
 0x34e   :  { %v1152_v8 = vld [vmem:[#allocation9 + $0xf8] sm:$0xff]  ;;  %v3221_v13 = vcombine.high %v1147_v5, %v1151_v6  ;;  %v1199_v62 = vld [vmem:[#allocation9 + $0x270] sm:$0xff] }
 0x34f   :  { %v3223_v14 = vcombine.high %v1148_v7, %v1152_v8  ;;  %v3222_v21 = vcombine.low %v1148_v7, %v1152_v8  ;;  %v1204_v7 = vld [vmem:[#allocation9 + $0x298] sm:$0xff] }
 0x350   :  { %2765 = vmatpush1.bf16.msra.mxu1 %v3416_v16  ;;  %2847 = vmatpush1.bf16.msra.mxu0 %v3418_v17  ;;  %v1155_v16 = vld [vmem:[#allocation9 + $0x110] sm:$0xff]  ;;  %v1208_v8 = vld [vmem:[#allocation9 + $0x2b8] sm:$0xff] }
 0x351   :  { %2766 = vmatprep.subr.bf16.mxu1 %v3425_v19  ;;  %2848 = vmatprep.subr.bf16.mxu0 %v3427_v20  ;;  %v1159_v17 = vld [vmem:[#allocation9 + $0x130] sm:$0xff]  ;;  %v1160_v19 = vld [vmem:[#allocation9 + $0x138] sm:$0xff]  ;;  %v3220_v20 = vcombine.low %v1147_v5, %v1151_v6 }
 0x352   :  { %v3229_v22 = vcombine.high %v1155_v16, %v1159_v17  ;;  %v1203_v5 = vld [vmem:[#allocation9 + $0x290] sm:$0xff] }
 0x353   :  { %v1207_v6 = vld [vmem:[#allocation9 + $0x2b0] sm:$0xff] }
 0x354   :  { %2767 = vmatpush1.bf16.msra.mxu1 %v3424_v25  ;;  %2849 = vmatpush1.bf16.msra.mxu0 %v3426_v26  ;;  %v1167_v25 = vld [vmem:[#allocation9 + $0x170] sm:$0xff]  ;;  %v1164_v26 = vld [vmem:[#allocation9 + $0x158] sm:$0xff] }
 0x355   :  { %2768 = vmatprep.subr.bf16.mxu1 %v3433_v28  ;;  %2850 = vmatprep.subr.bf16.mxu0 %v3435_v29  ;;  %v3228_v28 = vcombine.low %v1155_v16, %v1159_v17  ;;  %v3237_v30 = vcombine.high %v1163_v24, %v1167_v25  ;;  %v3239_v31 = vcombine.high %v1164_v26, %v1168_v27  ;;  %v1211_v16 = vld [vmem:[#allocation9 + $0x2d0] sm:$0xff] }
 0x356   :  { %v3236_v38 = vcombine.low %v1163_v24, %v1167_v25  ;;  %v1215_v17 = vld [vmem:[#allocation9 + $0x2f0] sm:$0xff] }
 0x357   :  { %v1219_v24 = vld [vmem:[#allocation9 + $0x310] sm:$0xff] }
 0x358   :  { %2769 = vmatpush1.bf16.msra.mxu1 %v3432_v36  ;;  %2851 = vmatpush1.bf16.msra.mxu0 %v3434_v37  ;;  %v1172_v36 = vld [vmem:[#allocation9 + $0x198] sm:$0xff]  ;;  %v1223_v25 = vld [vmem:[#allocation9 + $0x330] sm:$0xff] }
 0x359   :  { %2770 = vmatprep.subr.bf16.mxu1 %v3441_v39  ;;  %2852 = vmatprep.subr.bf16.mxu0 %v3443_v41  ;;  %v1176_v37 = vld [vmem:[#allocation9 + $0x1b8] sm:$0xff]  ;;  %v3238_v39 = vcombine.low %v1164_v26, %v1168_v27  ;;  %v3245_v41 = vcombine.high %v1171_v34, %v1175_v35 }
 0x35a   :  { %v3247_v42 = vcombine.high %v1172_v36, %v1176_v37  ;;  %v3246_v47 = vcombine.low %v1172_v36, %v1176_v37  ;;  %v1220_v26 = vld [vmem:[#allocation9 + $0x318] sm:$0xff] }
 0x35b   :  { %v1224_v27 = vld [vmem:[#allocation9 + $0x338] sm:$0xff] }
 0x35c   :  { %2771 = vmatpush1.bf16.msra.mxu1 %v3440_v45  ;;  %2853 = vmatpush1.bf16.msra.mxu0 %v3442_v46  ;;  %v1184_v45 = vld [vmem:[#allocation9 + $0x1f8] sm:$0xff]  ;;  %v3244_v46 = vcombine.low %v1171_v34, %v1175_v35  ;;  %v1227_v34 = vld [vmem:[#allocation9 + $0x350] sm:$0xff] }
 0x35d   :  { %2863 = vmatprep.subr.bf16.mxu1 %v3197_v48  ;;  %2945 = vmatprep.subr.bf16.mxu0 %v3199_v49  ;;  %v3253_v48 = vcombine.high %v1179_v9, %v1183_v43  ;;  %v3255_v49 = vcombine.high %v1180_v44, %v1184_v45  ;;  %v1231_v35 = vld [vmem:[#allocation9 + $0x370] sm:$0xff]  ;;  %v1228_v36 = vld [vmem:[#allocation9 + $0x358] sm:$0xff] }
 0x35e   :  { %v1232_v37 = vld [vmem:[#allocation9 + $0x378] sm:$0xff] }
 0x35f   :  { %2773 = vmatmul.mubr.bf16.vlgmr.msra.gmra.mrb[0].mxu1 %v4002_v57  ;;  %2855 = vmatmul.mubr.bf16.vlgmr.msra.gmra.mrb[4].mxu0 %v4002_v57 }
 0x360   :  { %2864 = vmatpush1.bf16.msra.mxu1 %v3196_v55  ;;  %2895 = vmatprep.mubr.bf16.mxu1 %v3984_v32  ;;  %v3252_v55 = vcombine.low %v1179_v9, %v1183_v43  ;;  %v1235_v9 = vld [vmem:[#allocation9 + $0x390] sm:$0xff] }
 0x361   :  { %2946 = vmatpush1.bf16.msra.mxu0 %v3198_v58  ;;  %2977 = vmatprep.mubr.bf16.mxu0 %v3984_v32  ;;  %v1156_v32 = vld [vmem:[#allocation9 + $0x118] sm:$0xff]  ;;  %v3254_v58 = vcombine.low %v1180_v44, %v1184_v45  ;;  %v1239_v43 = vld [vmem:[#allocation9 + $0x3b0] sm:$0xff] }
 0x362   :  { %2865 = vmatprep.subr.bf16.mxu1 %v3205_v59  ;;  %2947 = vmatprep.subr.bf16.mxu0 %v3207_v60  ;;  %v3231_v23 = vcombine.high %v1156_v32, %v1160_v19  ;;  %v3230_v29 = vcombine.low %v1156_v32, %v1160_v19  ;;  %v3261_v59 = vcombine.high %v1187_v50, %v1191_v51  ;;  %v1212_v32 = vld [vmem:[#allocation9 + $0x2d8] sm:$0xff] }
 0x363   :  { %v3263_v60 = vcombine.high %v1188_v15, %v1192_v52  ;;  %v1216_v19 = vld [vmem:[#allocation9 + $0x2f8] sm:$0xff] }
 0x364   :  { %2866 = vmatpush1.bf16.msra.mxu1 %v3204_v1  ;;  %v3260_v1 = vcombine.low %v1187_v50, %v1191_v51  ;;  %v1236_v44 = vld [vmem:[#allocation9 + $0x398] sm:$0xff]  ;;  %v1243_v50 = vld [vmem:[#allocation9 + $0x3d0] sm:$0xff] }
 0x365   :  { %2948 = vmatpush1.bf16.msra.mxu0 %v3206_v2  ;;  %2867 = vmatprep.subr.bf16.mxu1 %v3213_v3  ;;  %v3262_v2 = vcombine.low %v1188_v15, %v1192_v52  ;;  %v3269_v3 = vcombine.high %v1195_v61, %v1199_v62  ;;  %v1240_v45 = vld [vmem:[#allocation9 + $0x3b8] sm:$0xff]  ;;  %v1247_v51 = vld [vmem:[#allocation9 + $0x3f0] sm:$0xff] }
 0x366   :  { %2949 = vmatprep.subr.bf16.mxu0 %v3215_v4  ;;  %v3271_v4 = vcombine.high %v1196_v63, %v1200_v0  ;;  %v1244_v15 = vld [vmem:[#allocation9 + $0x3d8] sm:$0xff] }
 0x367   :  { %v1248_v52 = vld [vmem:[#allocation9 + $0x3f8] sm:$0xff] }
 0x368   :  { %2868 = vmatpush1.bf16.msra.mxu1 %v3212_v11  ;;  %v3268_v11 = vcombine.low %v1195_v61, %v1199_v62  ;;  %v1251_v61 = vld [vmem:[#allocation9 + $0x410] sm:$0xff] }
 0x369   :  { %2950 = vmatpush1.bf16.msra.mxu0 %v3214_v12  ;;  %2869 = vmatprep.subr.bf16.mxu1 %v3221_v13  ;;  %v3270_v12 = vcombine.low %v1196_v63, %v1200_v0  ;;  %v3277_v13 = vcombine.high %v1203_v5, %v1207_v6  ;;  %v1255_v62 = vld [vmem:[#allocation9 + $0x430] sm:$0xff]  ;;  %v1252_v63 = vld [vmem:[#allocation9 + $0x418] sm:$0xff] }
 0x36a   :  { %2951 = vmatprep.subr.bf16.mxu0 %v3223_v14  ;;  %v3279_v14 = vcombine.high %v1204_v7, %v1208_v8  ;;  %v1256_v0 = vld [vmem:[#allocation9 + $0x438] sm:$0xff] }
 0x36c   :  { %2870 = vmatpush1.bf16.msra.mxu1 %v3220_v20  ;;  %v3276_v20 = vcombine.low %v1203_v5, %v1207_v6  ;;  %v1259_v5 = vld [vmem:[#allocation9 + $0x450] sm:$0xff] }
 0x36d   :  { %2952 = vmatpush1.bf16.msra.mxu0 %v3222_v21  ;;  %2871 = vmatprep.subr.bf16.mxu1 %v3229_v22  ;;  %v3278_v21 = vcombine.low %v1204_v7, %v1208_v8  ;;  %v3285_v22 = vcombine.high %v1211_v16, %v1215_v17  ;;  %v1263_v6 = vld [vmem:[#allocation9 + $0x470] sm:$0xff]  ;;  %v3324_v7 = vcombine.low %v1251_v61, %v1255_v62  ;;  %v1260_v8 = vld [vmem:[#allocation9 + $0x458] sm:$0xff] }
 0x36e   :  { %2953 = vmatprep.subr.bf16.mxu0 %v3231_v23  ;;  %v3287_v23 = vcombine.high %v1212_v32, %v1216_v19 }
 0x370   :  { %2872 = vmatpush1.bf16.msra.mxu1 %v3228_v28  ;;  %v3284_v28 = vcombine.low %v1211_v16, %v1215_v17  ;;  %v1271_v16 = vld [vmem:[#allocation9 + $0x4b0] sm:$0xff] }
 0x371   :  { %2954 = vmatpush1.bf16.msra.mxu0 %v3230_v29  ;;  %2873 = vmatprep.subr.bf16.mxu1 %v3237_v30  ;;  %v3286_v29 = vcombine.low %v1212_v32, %v1216_v19  ;;  %v3293_v30 = vcombine.high %v1219_v24, %v1223_v25  ;;  %v1268_v32 = vld [vmem:[#allocation9 + $0x498] sm:$0xff] }
 0x372   :  { %2955 = vmatprep.subr.bf16.mxu0 %v3239_v31  ;;  %v3295_v31 = vcombine.high %v1220_v26, %v1224_v27  ;;  %v1272_v19 = vld [vmem:[#allocation9 + $0x4b8] sm:$0xff] }
 0x374   :  { %2874 = vmatpush1.bf16.msra.mxu1 %v3236_v38  ;;  %v3292_v38 = vcombine.low %v1219_v24, %v1223_v25  ;;  %v1275_v24 = vld [vmem:[#allocation9 + $0x4d0] sm:$0xff] }
 0x375   :  { %2956 = vmatpush1.bf16.msra.mxu0 %v3238_v39  ;;  %2875 = vmatprep.subr.bf16.mxu1 %v3245_v41  ;;  %v3294_v39 = vcombine.low %v1220_v26, %v1224_v27  ;;  %v3301_v41 = vcombine.high %v1227_v34, %v1231_v35  ;;  %v1279_v25 = vld [vmem:[#allocation9 + $0x4f0] sm:$0xff]  ;;  %v1276_v26 = vld [vmem:[#allocation9 + $0x4d8] sm:$0xff] }
 0x376   :  { %2957 = vmatprep.subr.bf16.mxu0 %v3247_v42  ;;  %v3303_v42 = vcombine.high %v1228_v36, %v1232_v37  ;;  %v1280_v27 = vld [vmem:[#allocation9 + $0x4f8] sm:$0xff] }
 0x378   :  { %2876 = vmatpush1.bf16.msra.mxu1 %v3244_v46  ;;  %v3300_v46 = vcombine.low %v1227_v34, %v1231_v35  ;;  %v1287_v34 = vld [vmem:[#allocation9 + $0x530] sm:$0xff]  ;;  %v1284_v35 = vld [vmem:[#allocation9 + $0x518] sm:$0xff] }
 0x379   :  { %2958 = vmatpush1.bf16.msra.mxu0 %v3246_v47  ;;  %2877 = vmatprep.subr.bf16.mxu1 %v3253_v48  ;;  %v3302_v47 = vcombine.low %v1228_v36, %v1232_v37  ;;  %v3309_v48 = vcombine.high %v1235_v9, %v1239_v43  ;;  %v1288_v36 = vld [vmem:[#allocation9 + $0x538] sm:$0xff]  ;;  %v3350_v37 = vcombine.low %v1276_v26, %v1280_v27 }
 0x37a   :  { %2959 = vmatprep.subr.bf16.mxu0 %v3255_v49  ;;  %v3311_v49 = vcombine.high %v1236_v44, %v1240_v45 }
 0x37c   :  { %2878 = vmatpush1.bf16.msra.mxu1 %v3252_v55  ;;  %v3308_v55 = vcombine.low %v1235_v9, %v1239_v43  ;;  %v1292_v9 = vld [vmem:[#allocation9 + $0x558] sm:$0xff] }
 0x37d   :  { %2960 = vmatpush1.bf16.msra.mxu0 %v3254_v58  ;;  %2879 = vmatprep.subr.bf16.mxu1 %v3261_v59  ;;  %v3310_v58 = vcombine.low %v1236_v44, %v1240_v45  ;;  %v3317_v59 = vcombine.high %v1243_v50, %v1247_v51  ;;  %v1296_v43 = vld [vmem:[#allocation9 + $0x578] sm:$0xff]  ;;  %v3358_v45 = vcombine.low %v1284_v35, %v1288_v36 }
 0x37e   :  { %2961 = vmatprep.subr.bf16.mxu0 %v3263_v60  ;;  %v3319_v60 = vcombine.high %v1244_v15, %v1248_v52 }
 0x380   :  { %2880 = vmatpush1.bf16.msra.mxu1 %v3260_v1  ;;  %v3316_v1 = vcombine.low %v1243_v50, %v1247_v51  ;;  %v1300_v50 = vld [vmem:[#allocation9 + $0x598] sm:$0xff] }
 0x381   :  { %2962 = vmatpush1.bf16.msra.mxu0 %v3262_v2  ;;  %2881 = vmatprep.subr.bf16.mxu1 %v3269_v3  ;;  %v3318_v2 = vcombine.low %v1244_v15, %v1248_v52  ;;  %v3325_v3 = vcombine.high %v1251_v61, %v1255_v62  ;;  %v1304_v51 = vld [vmem:[#allocation9 + $0x5b8] sm:$0xff]  ;;  %v3366_v52 = vcombine.low %v1292_v9, %v1296_v43 }
 0x382   :  { %2963 = vmatprep.subr.bf16.mxu0 %v3271_v4  ;;  %v3327_v4 = vcombine.high %v1252_v63, %v1256_v0  ;;  %v1308_v61 = vld [vmem:[#allocation9 + $0x5d8] sm:$0xff] }
 0x383   :  { %v1312_v62 = vld [vmem:[#allocation9 + $0x5f8] sm:$0xff] }
 0x384   :  { %2882 = vmatpush1.bf16.msra.mxu1 %v3268_v11  ;;  %v1264_v11 = vld [vmem:[#allocation9 + $0x478] sm:$0xff] }
 0x385   :  { %2964 = vmatpush1.bf16.msra.mxu0 %v3270_v12  ;;  %2883 = vmatprep.subr.bf16.mxu1 %v3277_v13  ;;  %v3326_v12 = vcombine.low %v1252_v63, %v1256_v0  ;;  %v3333_v13 = vcombine.high %v1259_v5, %v1263_v6  ;;  %v3335_v17 = vcombine.high %v1260_v8, %v1264_v11 }
 0x386   :  { %2965 = vmatprep.subr.bf16.mxu0 %v3279_v14  ;;  %v1267_v14 = vld [vmem:[#allocation9 + $0x490] sm:$0xff]  ;;  %v3374_v0 = vcombine.low %v1300_v50, %v1304_v51 }
 0x388   :  { %2884 = vmatpush1.bf16.msra.mxu1 %v3276_v20  ;;  %v3332_v20 = vcombine.low %v1259_v5, %v1263_v6  ;;  %v1316_v5 = vld [vmem:[#allocation9 + $0x618] sm:$0xff] }
 0x389   :  { %2966 = vmatpush1.bf16.msra.mxu0 %v3278_v21  ;;  %2885 = vmatprep.subr.bf16.mxu1 %v3285_v22  ;;  %v3334_v21 = vcombine.low %v1260_v8, %v1264_v11  ;;  %v3341_v22 = vcombine.high %v1267_v14, %v1271_v16  ;;  %v1320_v6 = vld [vmem:[#allocation9 + $0x638] sm:$0xff]  ;;  %v3382_v8 = vcombine.low %v1308_v61, %v1312_v62 }
 0x38a   :  { %2967 = vmatprep.subr.bf16.mxu0 %v3287_v23  ;;  %v3343_v23 = vcombine.high %v1268_v32, %v1272_v19 }
 0x38c   :  { %2886 = vmatpush1.bf16.msra.mxu1 %v3284_v28  ;;  %v3340_v28 = vcombine.low %v1267_v14, %v1271_v16  ;;  %v1327_v14 = vld [vmem:[#allocation9 + $0x670] sm:$0xff]  ;;  %v1324_v16 = vld [vmem:[#allocation9 + $0x658] sm:$0xff] }
 0x38d   :  { %2968 = vmatpush1.bf16.msra.mxu0 %v3286_v29  ;;  %2887 = vmatprep.subr.bf16.mxu1 %v3293_v30  ;;  %v3349_v29 = vcombine.high %v1275_v24, %v1279_v25  ;;  %v3351_v30 = vcombine.high %v1276_v26, %v1280_v27 }
 0x38e   :  { %2969 = vmatprep.subr.bf16.mxu0 %v3295_v31  ;;  %v1283_v31 = vld [vmem:[#allocation9 + $0x510] sm:$0xff] }
 0x38f   :  { %v3356_v44 = vcombine.low %v1283_v31, %v1287_v34 }
 0x390   :  { %2888 = vmatpush1.bf16.msra.mxu1 %v3292_v38  ;;  %v3357_v38 = vcombine.high %v1283_v31, %v1287_v34  ;;  %v1340_v31 = vld [vmem:[#allocation9 + $0x6d8] sm:$0xff] }
 0x391   :  { %2970 = vmatpush1.bf16.msra.mxu0 %v3294_v39  ;;  %2889 = vmatprep.subr.bf16.mxu1 %v3301_v41  ;;  %v3359_v39 = vcombine.high %v1284_v35, %v1288_v36  ;;  %v1291_v41 = vld [vmem:[#allocation9 + $0x550] sm:$0xff]  ;;  %v1344_v34 = vld [vmem:[#allocation9 + $0x6f8] sm:$0xff] }
 0x392   :  { %2971 = vmatprep.subr.bf16.mxu0 %v3303_v42  ;;  %v1295_v42 = vld [vmem:[#allocation9 + $0x570] sm:$0xff] }
 0x393   :  { %v3364_v15 = vcombine.low %v1291_v41, %v1295_v42 }
 0x394   :  { %2890 = vmatpush1.bf16.msra.mxu1 %v3300_v46  ;;  %v3365_v46 = vcombine.high %v1291_v41, %v1295_v42  ;;  %v1348_v41 = vld [vmem:[#allocation9 + $0x718] sm:$0xff] }
 0x395   :  { %2972 = vmatpush1.bf16.msra.mxu0 %v3302_v47  ;;  %2891 = vmatprep.subr.bf16.mxu1 %v3309_v48  ;;  %v3367_v47 = vcombine.high %v1292_v9, %v1296_v43  ;;  %v1299_v48 = vld [vmem:[#allocation9 + $0x590] sm:$0xff]  ;;  %v1352_v42 = vld [vmem:[#allocation9 + $0x738] sm:$0xff]  ;;  %v3414_v43 = vcombine.low %v1340_v31, %v1344_v34 }
 0x396   :  { %2973 = vmatprep.subr.bf16.mxu0 %v3311_v49  ;;  %v1303_v49 = vld [vmem:[#allocation9 + $0x5b0] sm:$0xff] }
 0x397   :  { %v3372_v63 = vcombine.low %v1299_v48, %v1303_v49 }
 0x398   :  { %2892 = vmatpush1.bf16.msra.mxu1 %v3308_v55  ;;  %v3373_v55 = vcombine.high %v1299_v48, %v1303_v49  ;;  %v1356_v48 = vld [vmem:[#allocation9 + $0x758] sm:$0xff] }
 0x399   :  { %2974 = vmatpush1.bf16.msra.mxu0 %v3310_v58  ;;  %2893 = vmatprep.subr.bf16.mxu1 %v3317_v59  ;;  %v3375_v58 = vcombine.high %v1300_v50, %v1304_v51  ;;  %v1307_v59 = vld [vmem:[#allocation9 + $0x5d0] sm:$0xff]  ;;  %v1360_v49 = vld [vmem:[#allocation9 + $0x778] sm:$0xff]  ;;  %v3422_v51 = vcombine.low %v1348_v41, %v1352_v42 }
 0x39a   :  { %2975 = vmatprep.subr.bf16.mxu0 %v3319_v60  ;;  %v1311_v60 = vld [vmem:[#allocation9 + $0x5f0] sm:$0xff] }
 0x39c   :  { %2894 = vmatpush1.bf16.msra.mxu1 %v3316_v1  ;;  %v3381_v1 = vcombine.high %v1307_v59, %v1311_v60 }
 0x39d   :  { %2976 = vmatpush1.bf16.msra.mxu0 %v3318_v2  ;;  %2904 = vmatprep.subr.bf16.mxu1 %v3325_v3  ;;  %v3383_v2 = vcombine.high %v1308_v61, %v1312_v62  ;;  %v1315_v3 = vld [vmem:[#allocation9 + $0x610] sm:$0xff]  ;;  %v3430_v62 = vcombine.low %v1356_v48, %v1360_v49 }
 0x39e   :  { %2986 = vmatprep.subr.bf16.mxu0 %v3327_v4  ;;  %v1319_v4 = vld [vmem:[#allocation9 + $0x630] sm:$0xff] }
 0x39f   :  { %2896 = vmatmul.mubr.bf16.vlgmr.msra.gmra.mrb[4].mxu1 %v3986_v33  ;;  %v3389_v11 = vcombine.high %v1315_v3, %v1319_v4 }
 0x3a0   :  { %2978 = vmatmul.mubr.bf16.vlgmr.msra.gmra.mrb[8].mxu0 %v3986_v33  ;;  %2905 = vmatpush1.bf16.msra.mxu1 %v3324_v7  ;;  %v3342_v33 = vcombine.low %v1268_v32, %v1272_v19  ;;  %v3380_v7 = vcombine.low %v1307_v59, %v1311_v60  ;;  %v3388_v32 = vcombine.low %v1315_v3, %v1319_v4  ;;  %v1364_v59 = vld [vmem:[#allocation9 + $0x798] sm:$0xff] }
 0x3a1   :  { %2936 = vmatprep.mubr.bf16.mxu1 %v3990_v40  ;;  %2987 = vmatpush1.bf16.msra.mxu0 %v3326_v12  ;;  %v3391_v12 = vcombine.high %v1316_v5, %v1320_v6  ;;  %v3390_v19 = vcombine.low %v1316_v5, %v1320_v6  ;;  %v1368_v60 = vld [vmem:[#allocation9 + $0x7b8] sm:$0xff] }
 0x3a2   :  { %3018 = vmatprep.mubr.bf16.mxu0 %v3990_v40  ;;  %2906 = vmatprep.subr.bf16.mxu1 %v3333_v13  ;;  %v3348_v40 = vcombine.low %v1275_v24, %v1279_v25  ;;  %v1323_v13 = vld [vmem:[#allocation9 + $0x650] sm:$0xff]  ;;  %v1332_v24 = vld [vmem:[#allocation9 + $0x698] sm:$0xff]  ;;  %v3438_v6 = vcombine.low %v1364_v59, %v1368_v60 }
 0x3a3   :  { %2988 = vmatprep.subr.bf16.mxu0 %v3335_v17  ;;  %v1328_v17 = vld [vmem:[#allocation9 + $0x678] sm:$0xff]  ;;  %v3396_v26 = vcombine.low %v1323_v13, %v1327_v14 }
 0x3a4   :  { %2907 = vmatpush1.bf16.msra.mxu1 %v3332_v20  ;;  %v3397_v20 = vcombine.high %v1323_v13, %v1327_v14  ;;  %v1336_v25 = vld [vmem:[#allocation9 + $0x6b8] sm:$0xff]  ;;  %v3398_v27 = vcombine.low %v1324_v16, %v1328_v17  ;;  %v1377_v14 = vld [vmem:[#allocation10] sm:$0xff] }
 0x3a5   :  { %2989 = vmatpush1.bf16.msra.mxu0 %v3334_v21  ;;  %2908 = vmatprep.subr.bf16.mxu1 %v3341_v22  ;;  %v3399_v21 = vcombine.high %v1324_v16, %v1328_v17  ;;  %v1331_v22 = vld [vmem:[#allocation9 + $0x690] sm:$0xff]  ;;  %v3406_v36 = vcombine.low %v1332_v24, %v1336_v25  ;;  %v1372_v3 = vld [vmem:[#allocation9 + $0x7d8] sm:$0xff]  ;;  %v1382_v17 = vrot.slane %v1377_v14, %v3961_v54 }
 0x3a6   :  { %2990 = vmatprep.subr.bf16.mxu0 %v3343_v23  ;;  %v1335_v23 = vld [vmem:[#allocation9 + $0x6b0] sm:$0xff]  ;;  %v1376_v4 = vld [vmem:[#allocation9 + $0x7f8] sm:$0xff] }
 0x3a7   :  { %v3404_v35 = vcombine.low %v1331_v22, %v1335_v23  ;;  %v210_v13 = vld [vmem:[#allocation6] sm:$0xff] }
 0x3a8   :  { %2909 = vmatpush1.bf16.msra.mxu1 %v3340_v28  ;;  %v3405_v28 = vcombine.high %v1331_v22, %v1335_v23  ;;  %v217_v16 = vrot.slane %v210_v13, %v3961_v54  ;;  %v3821_v22 = vmov 1983009808  }
 0x3a9   :  { %2991 = vmatpush1.bf16.msra.mxu0 %v3342_v33  ;;  %2910 = vmatprep.subr.bf16.mxu1 %v3349_v29  ;;  %v3407_v33 = vcombine.high %v1332_v24, %v1336_v25  ;;  %v1339_v29 = vld [vmem:[#allocation9 + $0x6d0] sm:$0xff]  ;;  %v3046_v23 = vunpack.c.l.s4 %v3821_v22  ;;  %v229_v24 = vrot.slane %v210_v13, %v3974_v10 }
 0x3aa   :  { %2992 = vmatprep.subr.bf16.mxu0 %v3351_v30  ;;  %v1343_v30 = vld [vmem:[#allocation9 + $0x6f0] sm:$0xff]  ;;  %v3459_v25 = vadd.f32 %v1382_v17, %v217_v16 }
 0x3ab   :  { %v3412_v9 = vcombine.low %v1339_v29, %v1343_v30 }
 0x3ac   :  { %2911 = vmatpush1.bf16.msra.mxu1 %v3348_v40  ;;  %v3413_v40 = vcombine.high %v1339_v29, %v1343_v30 }
 0x3ad   :  { %2993 = vmatpush1.bf16.msra.mxu0 %v3350_v37  ;;  %2912 = vmatprep.subr.bf16.mxu1 %v3357_v38  ;;  %v3415_v37 = vcombine.high %v1340_v31, %v1344_v34  ;;  %v1347_v38 = vld [vmem:[#allocation9 + $0x710] sm:$0xff] }
 0x3ae   :  { %2994 = vmatprep.subr.bf16.mxu0 %v3359_v39  ;;  %v1351_v39 = vld [vmem:[#allocation9 + $0x730] sm:$0xff] }
 0x3af   :  { %v3420_v50 = vcombine.low %v1347_v38, %v1351_v39 }
 0x3b0   :  { %2913 = vmatpush1.bf16.msra.mxu1 %v3356_v44  ;;  %v3421_v44 = vcombine.high %v1347_v38, %v1351_v39 }
 0x3b1   :  { %2995 = vmatpush1.bf16.msra.mxu0 %v3358_v45  ;;  %2914 = vmatprep.subr.bf16.mxu1 %v3365_v46  ;;  %v3423_v45 = vcombine.high %v1348_v41, %v1352_v42  ;;  %v1355_v46 = vld [vmem:[#allocation9 + $0x750] sm:$0xff] }
 0x3b2   :  { %2996 = vmatprep.subr.bf16.mxu0 %v3367_v47  ;;  %v1359_v47 = vld [vmem:[#allocation9 + $0x770] sm:$0xff] }
 0x3b3   :  { %v3428_v61 = vcombine.low %v1355_v46, %v1359_v47 }
 0x3b4   :  { %2915 = vmatpush1.bf16.msra.mxu1 %v3364_v15  ;;  %v3429_v15 = vcombine.high %v1355_v46, %v1359_v47  ;;  %v236_v46 = vsub.s32 5, %v3958_v53  ;;  %v244_v47 = vsub.s32 7, %v3958_v53 }
 0x3b5   :  { %2997 = vmatpush1.bf16.msra.mxu0 %v3366_v52  ;;  %2916 = vmatprep.subr.bf16.mxu1 %v3373_v55  ;;  %v3431_v52 = vcombine.high %v1356_v48, %v1360_v49  ;;  %v1363_v55 = vld [vmem:[#allocation9 + $0x790] sm:$0xff] }
 0x3b6   :  { %2998 = vmatprep.subr.bf16.mxu0 %v3375_v58  ;;  %v1367_v58 = vld [vmem:[#allocation9 + $0x7b0] sm:$0xff] }
 0x3b7   :  { %v3436_v5 = vcombine.low %v1363_v55, %v1367_v58 }
 0x3b8   :  { %2917 = vmatpush1.bf16.msra.mxu1 %v3372_v63  ;;  %v3437_v63 = vcombine.high %v1363_v55, %v1367_v58  ;;  %v245_v55 = vrot.slane %v210_v13, %v244_v47  ;;  %v1410_v58 = vrot.slane %v1377_v14, %v244_v47 }
 0x3b9   :  { %2999 = vmatpush1.bf16.msra.mxu0 %v3374_v0  ;;  %2918 = vmatprep.subr.bf16.mxu1 %v3381_v1  ;;  %v3439_v0 = vcombine.high %v1364_v59, %v1368_v60  ;;  %v1371_v1 = vld [vmem:[#allocation9 + $0x7d0] sm:$0xff] }
 0x3ba   :  { %3000 = vmatprep.subr.bf16.mxu0 %v3383_v2  ;;  %v1375_v2 = vld [vmem:[#allocation9 + $0x7f0] sm:$0xff] }
 0x3bc   :  { %2919 = vmatpush1.bf16.msra.mxu1 %v3380_v7  ;;  %v3445_v7 = vcombine.high %v1371_v1, %v1375_v2 }
 0x3bd   :  { %3001 = vmatpush1.bf16.msra.mxu0 %v3382_v8  ;;  %2920 = vmatprep.subr.bf16.mxu1 %v3389_v11  ;;  %v3447_v8 = vcombine.high %v1372_v3, %v1376_v4  ;;  %v3444_v11 = vcombine.low %v1371_v1, %v1375_v2 }
 0x3be   :  { %3002 = vmatprep.subr.bf16.mxu0 %v3391_v12  ;;  %v3446_v12 = vcombine.low %v1372_v3, %v1376_v4 }
 0x3c0   :  { %2921 = vmatpush1.bf16.msra.mxu1 %v3388_v32  ;;  %v225_v32 = vrot.slane %v210_v13, %v3997_v18 }
 0x3c1   :  { %3003 = vmatpush1.bf16.msra.mxu0 %v3390_v19  ;;  %2922 = vmatprep.subr.bf16.mxu1 %v3397_v20  ;;  %v1390_v19 = vrot.slane %v1377_v14, %v3997_v18  ;;  %v221_v20 = vrot.slane %v210_v13, %v3964_v56 }
 0x3c2   :  { %3004 = vmatprep.subr.bf16.mxu0 %v3399_v21  ;;  %v1386_v21 = vrot.slane %v1377_v14, %v3964_v56 }
 0x3c4   :  { %2923 = vmatpush1.bf16.msra.mxu1 %v3396_v26  ;;  %v3463_v26 = vadd.f32 %v1390_v19, %v225_v32 }
 0x3c5   :  { %3005 = vmatpush1.bf16.msra.mxu0 %v3398_v27  ;;  %2924 = vmatprep.subr.bf16.mxu1 %v3405_v28  ;;  %v3461_v27 = vadd.f32 %v1386_v21, %v221_v20  ;;  %v3047_v28 = vunpack.c.0.s8 %v3046_v23 }
 0x3c6   :  { %3006 = vmatprep.subr.bf16.mxu0 %v3407_v33 }
 0x3c7   :  { %v3050_v56 = vsub.s32 %v3047_v28, %v3958_v53 }
 0x3c8   :  { %2925 = vmatpush1.bf16.msra.mxu1 %v3404_v35 }
 0x3c9   :  { %3007 = vmatpush1.bf16.msra.mxu0 %v3406_v36  ;;  %2926 = vmatprep.subr.bf16.mxu1 %v3413_v40 }
 0x3ca   :  { %3008 = vmatprep.subr.bf16.mxu0 %v3415_v37 }
 0x3cc   :  { %2927 = vmatpush1.bf16.msra.mxu1 %v3412_v9 }
 0x3cd   :  { %3009 = vmatpush1.bf16.msra.mxu0 %v3414_v43  ;;  %2928 = vmatprep.subr.bf16.mxu1 %v3421_v44  ;;  %v232_v44 = vsub.s32 4, %v3958_v53 }
 0x3ce   :  { %3010 = vmatprep.subr.bf16.mxu0 %v3423_v45  ;;  %v240_v45 = vsub.s32 6, %v3958_v53 }
 0x3cf   :  { %v233_v48 = vrot.slane %v210_v13, %v232_v44  ;;  %v1398_v49 = vrot.slane %v1377_v14, %v232_v44 }
 0x3d0   :  { %2929 = vmatpush1.bf16.msra.mxu1 %v3420_v50  ;;  %v241_v50 = vrot.slane %v210_v13, %v240_v45 }
 0x3d1   :  { %3011 = vmatpush1.bf16.msra.mxu0 %v3422_v51  ;;  %2930 = vmatprep.subr.bf16.mxu1 %v3429_v15  ;;  %v1406_v51 = vrot.slane %v1377_v14, %v240_v45  ;;  %v237_v15 = vrot.slane %v210_v13, %v236_v46  ;;  %v3467_v59 = vadd.f32 %v1398_v49, %v233_v48 }
 0x3d2   :  { %3012 = vmatprep.subr.bf16.mxu0 %v3431_v52  ;;  %v1402_v52 = vrot.slane %v1377_v14, %v236_v46 }
 0x3d3   :  { %v3471_v60 = vadd.f32 %v1406_v51, %v241_v50 }
 0x3d4   :  { %2931 = vmatpush1.bf16.msra.mxu1 %v3428_v61  ;;  %v3469_v61 = vadd.f32 %v1402_v52, %v237_v15 }
 0x3d5   :  { %3013 = vmatpush1.bf16.msra.mxu0 %v3430_v62  ;;  %2932 = vmatprep.subr.bf16.mxu1 %v3437_v63  ;;  %v3473_v62 = vadd.f32 %v1410_v58, %v245_v55 }
 0x3d6   :  { %3014 = vmatprep.subr.bf16.mxu0 %v3439_v0 }
 0x3d8   :  { %2933 = vmatpush1.bf16.msra.mxu1 %v3436_v5 }
 0x3d9   :  { %3015 = vmatpush1.bf16.msra.mxu0 %v3438_v6  ;;  %2934 = vmatprep.subr.bf16.mxu1 %v3445_v7 }
 0x3da   :  { %3016 = vmatprep.subr.bf16.mxu0 %v3447_v8 }
 0x3dc   :  { %2935 = vmatpush1.bf16.msra.mxu1 %v3444_v11 }
 0x3dd   :  { %3017 = vmatpush1.bf16.msra.mxu0 %v3446_v12 }
 0x3df   :  { %2937 = vmatmul.mubr.bf16.vlgmr.msra.gmra.mrb[4].mxu1 %v4002_v57 }
 0x3e0   :  { %3019 = vmatmul.mubr.bf16.vlgmr.msra.gmra.mrb[8].mxu0 %v4002_v57  ;;  %v1394_v57 = vrot.slane %v1377_v14, %v3974_v10 }
 0x3e2   :  { %v3465_v33 = vadd.f32 %v1394_v57, %v229_v24 }
 0x432   :  { %v2774_v54 = vpop.f32.mrb[0].mxu1  ;;  %v2856_v29 = vpop.f32.mrb[4].mxu0 }
 0x433   :  { %v3460_v30 = vadd.f32 %v3459_v25, %v2774_v54  ;;  %v3464_v31 = vadd.f32 %v3463_v26, %v2856_v29  ;;  %v2776_v18 = vpop.f32.mrb[1].mxu1  ;;  %v2858_v34 = vpop.f32.mrb[5].mxu0 }
 0x434   :  { %v3462_v35 = vadd.f32 %v3461_v27, %v2776_v18  ;;  %v3466_v36 = vadd.f32 %v3465_v33, %v2858_v34  ;;  %v2778_v40 = vpop.f32.mrb[2].mxu1  ;;  %v2860_v37 = vpop.f32.mrb[6].mxu0 }
 0x435   :  { %v2779_v38 = vpop.f32.mrb[3].mxu1  ;;  %v2861_v39 = vpop.f32.mrb[7].mxu0 }
 0x436   :  { %v3043_v10 = vcombine.low %v3460_v30, %v3462_v35  ;;  %v3044_v41 = vcombine.low %v3464_v31, %v3466_v36 }
 0x438   :  { %v3051_v42 = vrot.slane %v3043_v10, %v3050_v56  ;;  %v3058_v9 = vrot.slane %v3044_v41, %v3050_v56 }
 0x43a   :  { %v3059_v43 = vcombine.low %v3051_v42, %v3058_v9 }
 0x43c   :  { %3079 = vst [vmem:[%s4042_s9] sm:$0xff] %v3059_v43 }
 0x4b2   :  { %v2938_v63 = vpop.f32.mrb[4].mxu1 }
 0x4b3   :  { %v3468_v0 = vadd.f32 %v3467_v59, %v2938_v63  ;;  %v3020_v1 = vpop.f32.mrb[8].mxu0  ;;  %v2940_v2 = vpop.f32.mrb[5].mxu1 }
 0x4b4   :  { %v3472_v3 = vadd.f32 %v3471_v60, %v3020_v1  ;;  %v3470_v4 = vadd.f32 %v3469_v61, %v2940_v2  ;;  %v3022_v5 = vpop.f32.mrb[9].mxu0  ;;  %v2942_v53 = vpop.f32.mrb[6].mxu1 }
 0x4b5   :  { %v3474_v6 = vadd.f32 %v3473_v62, %v3022_v5  ;;  %v3024_v7 = vpop.f32.mrb[10].mxu0  ;;  %v2943_v8 = vpop.f32.mrb[7].mxu1 }
 0x4b6   :  { %v3060_v11 = vcombine.low %v3468_v0, %v3470_v4  ;;  %v3025_v12 = vpop.f32.mrb[11].mxu0 }
 0x4b7   :  { %v3061_v16 = vcombine.low %v3472_v3, %v3474_v6 }
 0x4b8   :  { %v3068_v13 = vrot.slane %v3060_v11, %v3050_v56 }
 0x4b9   :  { %v3075_v14 = vrot.slane %v3061_v16, %v3050_v56 }
 0x4bb   :  { %v3076_v17 = vcombine.low %v3068_v13, %v3075_v14 }
 0x4bd   :  { %3080 = vst [vmem:[%s4042_s9 + $0x8] sm:$0xff] %v3076_v17 }
 0x4be   :  { %3085 = vsyncpa [#allocation3], 1 }
 0x4bf   :  { %3086 = vsyncpa [#allocation5], 1 }
 0x4c0   :  { %3087 = vsyncpa [#allocation8], 1 }
 0x4c1   :  { %3088 = vsyncpa [#allocation11], 1 }

</bundles_post_ra>
